<compile_context>
chip_gen: v6e
topology: v6e:2x2x1
jax: 0.10.0
libtpu: 0.0.40
codegen_flags: <defaults>
</compile_context>

<pallas_src>
import jax
import jax.numpy as jnp
from jax import lax
from jax.experimental import pallas as pl
from jax.experimental.pallas import tpu as pltpu

_BN_EPS = 1e-5
_HP = lax.Precision.HIGHEST


def _round_up(x, m):
    return ((x + m - 1) // m) * m


def _fold_bn(w, b, gamma, beta):
    """Fold eval-mode BatchNorm1d (running_mean=0, running_var=1) into Linear."""
    s = gamma / jnp.sqrt(1.0 + _BN_EPS)
    return w * s[None, :], b * s + beta


def _pad1(v, n):
    return jnp.pad(v, (0, n - v.shape[0]))


# -----------------------------------------------------------------------------
# Parameter initialization (mirrors the PyTorch module's layer shapes).
# -----------------------------------------------------------------------------
def init_params(key, x_dim, h_dim, z_dim, max_num_nodes):
    N, F, H, Z = max_num_nodes, x_dim, h_dim, z_dim
    keys = jax.random.split(key, 10)

    def lin(k, fin, fout):
        kw, kb = jax.random.split(k)
        bound = 1.0 / jnp.sqrt(jnp.float32(fin))
        w = jax.random.uniform(kw, (fin, fout), jnp.float32, -bound, bound)
        b = jax.random.uniform(kb, (fout,), jnp.float32, -bound, bound)
        return w, b

    p = {}
    # DenseGCNConv: Linear(F, H, bias=False) + separate bias.  (Random bias so
    # the N*gcn_b -> encoder-bias fold is actually exercised by the check.)
    p['gcn_w'], _ = lin(keys[0], F, H)
    p['gcn_b'] = jax.random.uniform(keys[9], (H,), jnp.float32, -0.1, 0.1)

    w, b = lin(keys[1], H + 1, Z)
    p['em_wh'], p['em_wy'], p['em_b'] = w[:H], w[H:], b
    p['em_g'], p['em_be'] = jnp.ones((Z,), jnp.float32), jnp.zeros((Z,), jnp.float32)

    w, b = lin(keys[2], H + 1, Z)
    p['ev_wh'], p['ev_wy'], p['ev_b'] = w[:H], w[H:], b
    p['ev_g'], p['ev_be'] = jnp.ones((Z,), jnp.float32), jnp.zeros((Z,), jnp.float32)

    def dec_branch(k0, k1, k2, out_dim):
        w1, b1 = lin(k0, Z + 1, H)
        w2, b2 = lin(k1, H, H)
        w3, b3 = lin(k2, H, out_dim)
        return dict(w1z=w1[:Z], w1y=w1[Z:], b1=b1,
                    g1=jnp.ones((H,), jnp.float32), be1=jnp.zeros((H,), jnp.float32),
                    w2=w2, b2=b2,
                    g2=jnp.ones((H,), jnp.float32), be2=jnp.zeros((H,), jnp.float32),
                    w3=w3, b3=b3)

    p['dx'] = dec_branch(keys[3], keys[4], keys[5], N * F)
    p['da'] = dec_branch(keys[6], keys[7], keys[8], N * N)
    return p


# -----------------------------------------------------------------------------
# Host-side packing: fold BN affines, fuse parallel branches, concatenate the
# huge decoder output weights along (padded) columns, pack tiny vectors.
# -----------------------------------------------------------------------------
def pack_params(params, max_num_nodes, x_dim, tile_cols, w3_dtype=jnp.float32):
    p = params
    N, F = max_num_nodes, x_dim
    H = p['gcn_w'].shape[1]
    Z = p['em_wh'].shape[1]
    NF, NN = N * F, N * N

    # encoder mean||var heads: fold BN, fuse along output axis -> (H, 2Z)
    em_wf, em_bf = _fold_bn(jnp.concatenate([p['em_wh'], p['em_wy']], 0),
                            p['em_b'], p['em_g'], p['em_be'])
    ev_wf, ev_bf = _fold_bn(jnp.concatenate([p['ev_wh'], p['ev_wy']], 0),
                            p['ev_b'], p['ev_g'], p['ev_be'])
    enc_w = jnp.concatenate([em_wf[:H], ev_wf[:H]], axis=1)          # (H, 2Z)
    enc_wy = jnp.concatenate([em_wf[H], ev_wf[H]], axis=0)           # (2Z,)
    enc_b = jnp.concatenate([em_bf, ev_bf], axis=0)                  # (2Z,)
    # GCN bias contributes N*gcn_b to the pooled graph rep; fold it through the
    # (already BN-folded) encoder weight into the encoder bias.
    enc_b = enc_b + float(N) * (p['gcn_b'] @ enc_w)

    # decoder layers 1/2: fold BN, fuse dx||da branches
    dx, da = p['dx'], p['da']
    dx_w1f, dx_b1f = _fold_bn(jnp.concatenate([dx['w1z'], dx['w1y']], 0),
                              dx['b1'], dx['g1'], dx['be1'])
    da_w1f, da_b1f = _fold_bn(jnp.concatenate([da['w1z'], da['w1y']], 0),
                              da['b1'], da['g1'], da['be1'])
    dec1_w = jnp.concatenate([dx_w1f[:Z], da_w1f[:Z]], axis=1)       # (Z, 2H)
    dec1_wy = jnp.concatenate([dx_w1f[Z], da_w1f[Z]], axis=0)        # (2H,)
    dec1_b = jnp.concatenate([dx_b1f, da_b1f], axis=0)               # (2H,)

    dx_w2f, dx_b2f = _fold_bn(dx['w2'], dx['b2'], dx['g2'], dx['be2'])
    da_w2f, da_b2f = _fold_bn(da['w2'], da['b2'], da['g2'], da['be2'])
    dec2_w = jnp.zeros((2 * H, 2 * H), jnp.float32)                  # block-diag
    dec2_w = dec2_w.at[:H, :H].set(dx_w2f).at[H:, H:].set(da_w2f)
    dec2_b = jnp.concatenate([dx_b2f, da_b2f], axis=0)               # (2H,)

    # decoder layer 3: concat dx||da along output columns, padded per-branch to
    # a multiple of tile_cols so each grid step belongs to exactly one branch.
    nfp = _round_up(NF, tile_cols)
    nnp = _round_up(NN, tile_cols)
    w3 = jnp.zeros((H, nfp + nnp), jnp.float32)
    w3 = w3.at[:, :NF].set(dx['w3']).at[:, nfp:nfp + NN].set(da['w3'])
    b3 = jnp.zeros((1, nfp + nnp), jnp.float32)
    b3 = b3.at[0, :NF].set(dx['b3']).at[0, nfp:nfp + NN].set(da['b3'])

    # pack all small 1-D parameters into a single (5, PW) array (one DMA)
    PW = max(2 * Z, 2 * H)
    vec = jnp.stack([_pad1(enc_b, PW), _pad1(enc_wy, PW),
                     _pad1(dec1_b, PW), _pad1(dec1_wy, PW), _pad1(dec2_b, PW)])

    return dict(gcn_w=p['gcn_w'], enc_w=enc_w, dec1_w=dec1_w, dec2_w=dec2_w,
                vec=vec, w3=w3.astype(w3_dtype), b3=b3,
                H=H, Z=Z, nfp=nfp, nnp=nnp)


# -----------------------------------------------------------------------------
# Kernel
# -----------------------------------------------------------------------------
def _make_kernel(N, F, H, Z, nbx, prec_big):
    two_z, two_h = 2 * Z, 2 * H

    def kernel(feat_ref, adj_ref, ycf_ref, gcn_w_ref, enc_w_ref, dec1_w_ref,
               dec2_w_ref, vec_ref, w3_ref, b3_ref, zpack_ref, cols_ref, h2_scr):
        j = pl.program_id(0)

        # ---- step 0 only: GCN encoder + VAE heads + decoder layers 1/2 ------
        @pl.when(j == 0)
        def _():
            feats = feat_ref[...]                     # (B, N, F)
            adj = adj_ref[...]                        # (B, N, N)
            ycf = ycf_ref[...]                        # (B, 1)

            # DenseGCNConv(add_loop=True) fused with the node-sum pooling:
            #   graph_rep = sum_j (sum_i adj_norm[b,i,j]) * feats[b,j,:] @ W_gcn
            row = lax.broadcasted_iota(jnp.int32, (N, N), 0)
            col = lax.broadcasted_iota(jnp.int32, (N, N), 1)
            adj_sl = jnp.where((row == col)[None, :, :], 1.0, adj)
            deg = jnp.maximum(jnp.sum(adj_sl, axis=-1), 1.0)          # (B, N)
            dis = lax.rsqrt(deg)
            colw = jnp.sum(adj_sl * dis[:, :, None], axis=1) * dis    # (B, N)
            pooled = jnp.sum(colw[:, :, None] * feats, axis=1)        # (B, F)
            graph_rep = jnp.dot(pooled, gcn_w_ref[...],
                                preferred_element_type=jnp.float32,
                                precision=_HP)                        # (B, H)
            # (N * gcn_b is folded into the encoder bias host-side.)

            # encoder mean||var heads: Linear(+BN folded) -> ReLU (-> Sigmoid)
            pre = (jnp.dot(graph_rep, enc_w_ref[...],
                           preferred_element_type=jnp.float32, precision=_HP)
                   + ycf * vec_ref[1:2, :two_z]       # y_cf broadcast (VPU)
                   + vec_ref[0:1, :two_z])
            pre = jnp.maximum(pre, 0.0)                               # (B, 2Z)
            z_mu = pre[:, :Z]
            z_logvar = jax.nn.sigmoid(pre[:, Z:])
            zpack_ref[...] = jnp.concatenate([z_mu, z_logvar], axis=1)

            # eval-mode reparameterize: z = mu
            z = z_mu
            # decoder_x || decoder_a layers 1/2 (Linear+BN folded, ReLU)
            h1 = jnp.maximum(
                jnp.dot(z, dec1_w_ref[...],
                        preferred_element_type=jnp.float32, precision=_HP)
                + ycf * vec_ref[3:4, :two_h] + vec_ref[2:3, :two_h], 0.0)
            h2 = jnp.maximum(
                jnp.dot(h1, dec2_w_ref[...],
                        preferred_element_type=jnp.float32, precision=_HP)
                + vec_ref[4:5, :two_h], 0.0)                          # (B, 2H)
            # Pre-split + pre-cast per decoder branch so column steps are just
            # a select + one MXU matmul (no per-step slicing / casting math).
            h2_scr[0] = h2[:, :H].astype(h2_scr.dtype)                # features
            h2_scr[1] = h2[:, H:].astype(h2_scr.dtype)                # adjacency

        # ---- every step: one streamed column tile of the big decoder matmul -
        is_feat = j < nbx                              # feature vs adjacency branch
        h2_sel = jnp.where(is_feat, h2_scr[0], h2_scr[1])             # (B, H)
        pre = jnp.dot(h2_sel, w3_ref[...],
                      preferred_element_type=jnp.float32,
                      precision=prec_big) + b3_ref[...]
        cols_ref[...] = jnp.where(is_feat, pre, jax.nn.sigmoid(pre))

    return kernel


# -----------------------------------------------------------------------------
# Wrapper
# -----------------------------------------------------------------------------
def graphcfe_forward(features, adj, y_cf, params, *, tile_cols=None,
                     decoder_dtype=jnp.float32):
    B, N, F = features.shape
    NF, NN = N * F, N * N
    if tile_cols is None:
        # Lane-dense 128-multiples.  Big decoders: 512-lane tiles (fewer grid
        # steps, unmasked vst, fits scoped VMEM with double buffering).  Tiny
        # decoders: 128-lane tiles (minimal per-branch column padding).
        tile_cols = 512 if max(NF, NN) >= 2048 else 128

    pk = pack_params(params, N, F, tile_cols, w3_dtype=decoder_dtype)
    H, Z, nfp, nnp = pk['H'], pk['Z'], pk['nfp'], pk['nnp']
    c_total = nfp + nnp
    nbx = nfp // tile_cols            # number of feature-branch column tiles
    n_blocks = c_total // tile_cols

    prec_big = _HP if decoder_dtype == jnp.float32 else lax.Precision.DEFAULT
    kernel = _make_kernel(N, F, H, Z, nbx, prec_big)

    def whole(shape):
        nd = len(shape)
        return pl.BlockSpec(shape, lambda j, _nd=nd: (0,) * _nd)  # resident block

    in_specs = [
        whole((B, N, F)),                                  # features
        whole((B, N, N)),                                  # adj
        whole((B, 1)),                                     # y_cf
        whole(pk['gcn_w'].shape),
        whole(pk['enc_w'].shape),
        whole(pk['dec1_w'].shape),
        whole(pk['dec2_w'].shape),
        whole(pk['vec'].shape),
        pl.BlockSpec((H, tile_cols), lambda j: (0, j)),    # streamed W3 tiles
        pl.BlockSpec((1, tile_cols), lambda j: (0, j)),    # streamed b3 tiles
    ]
    out_specs = (
        pl.BlockSpec((B, 2 * Z), lambda j: (0, 0)),        # packed z_mu||z_logvar
        pl.BlockSpec((B, tile_cols), lambda j: (0, j)),    # lane-dense column tiles
    )
    out_shape = (
        jax.ShapeDtypeStruct((B, 2 * Z), jnp.float32),
        jax.ShapeDtypeStruct((B, c_total), jnp.float32),
    )

    zpack, cols = pl.pallas_call(
        kernel,
        grid=(n_blocks,),
        in_specs=in_specs,
        out_specs=out_specs,
        out_shape=out_shape,
        scratch_shapes=[pltpu.VMEM((2, B, H), decoder_dtype)],
        compiler_params=pltpu.CompilerParams(
            # step 0 fills the h2 scratch consumed by later column steps, so
            # the column axis must stay sequential.
            dimension_semantics=("arbitrary",),
            vmem_limit_bytes=32 * 1024 * 1024),
    )(features, adj, y_cf, pk['gcn_w'], pk['enc_w'], pk['dec1_w'],
      pk['dec2_w'], pk['vec'], pk['w3'], pk['b3'])

    return {
        'z_mu': zpack[:, :Z],
        'z_logvar': zpack[:, Z:],
        'adj_permuted': adj,
        'features_permuted': features,
        'adj_reconst': cols[:, nfp:nfp + NN].reshape(B, N, N),
        'features_reconst': cols[:, :NF].reshape(B, N, F),
        'z_u_mu': jnp.zeros((B, H), jnp.float32),
        'z_u_logvar': jnp.ones((B, H), jnp.float32),
    }


# -----------------------------------------------------------------------------
# Pure-JAX reference of the same eval-mode forward (unfused) for validation.
# -----------------------------------------------------------------------------
def graphcfe_reference(features, adj, y_cf, p):
    B, N, F = features.shape
    eye = jnp.eye(N, dtype=bool)
    adj_sl = jnp.where(eye[None], 1.0, adj)
    h = jnp.einsum('bnf,fh->bnh', features, p['gcn_w'], precision=_HP)
    deg = jnp.maximum(adj_sl.sum(-1), 1.0)
    dis = 1.0 / jnp.sqrt(deg)
    adj_norm = dis[:, :, None] * adj_sl * dis[:, None, :]
    h = jnp.einsum('bij,bjh->bih', adj_norm, h, precision=_HP) + p['gcn_b']
    graph_rep = h.sum(axis=1)

    bn = lambda x, g, b: x / jnp.sqrt(1.0 + _BN_EPS) * g + b

    def head(wh, wy, b, g, be):
        pre = (jnp.dot(graph_rep, wh, precision=_HP)
               + jnp.dot(y_cf, wy, precision=_HP) + b)
        return jnp.maximum(bn(pre, g, be), 0.0)

    z_mu = head(p['em_wh'], p['em_wy'], p['em_b'], p['em_g'], p['em_be'])
    z_logvar = jax.nn.sigmoid(head(p['ev_wh'], p['ev_wy'], p['ev_b'],
                                   p['ev_g'], p['ev_be']))
    z = z_mu

    def dec(d):
        h1 = jnp.maximum(bn(jnp.dot(z, d['w1z'], precision=_HP)
                            + jnp.dot(y_cf, d['w1y'], precision=_HP) + d['b1'],
                            d['g1'], d['be1']), 0.0)
        h2 = jnp.maximum(bn(jnp.dot(h1, d['w2'], precision=_HP) + d['b2'],
                            d['g2'], d['be2']), 0.0)
        return jnp.dot(h2, d['w3'], precision=_HP) + d['b3']

    feat_rec = dec(p['dx']).reshape(B, N, F)
    adj_rec = jax.nn.sigmoid(dec(p['da'])).reshape(B, N, N)
    return z_mu, z_logvar, feat_rec, adj_rec


if __name__ == "__main__":
    B, N, F, H = 4, 16, 8, 32   # batch, max_num_nodes, num_node_features, hidden_dim
    Z = H                        # module sets z_dim = hidden_dim

    key = jax.random.PRNGKey(0)
    k_feat, k_adj, k_y, k_par = jax.random.split(key, 4)

    features = jax.random.normal(k_feat, (B, N, F), jnp.float32)
    a = (jax.random.uniform(k_adj, (B, N, N)) < 0.3).astype(jnp.float32)
    adj = jnp.maximum(a, jnp.swapaxes(a, 1, 2))                 # symmetric 0/1 adjacency
    y_cf = (jax.random.uniform(k_y, (B, 1)) < 0.5).astype(jnp.float32)

    params = init_params(k_par, F, H, Z, N)

    # f32 decoder path (tight check vs unfused pure-JAX reference)
    out = graphcfe_forward(features, adj, y_cf, params)
    jax.block_until_ready(out)

    ref_zmu, ref_zlv, ref_feat, ref_adj = graphcfe_reference(features, adj, y_cf, params)
    checks = [
        (out['z_mu'], ref_zmu), (out['z_logvar'], ref_zlv),
        (out['features_reconst'], ref_feat), (out['adj_reconst'], ref_adj),
    ]
    for g, r in checks:
        assert g.shape == r.shape, "shape mismatch vs reference"
        assert jnp.allclose(g, r, atol=1e-3, rtol=1e-3), "mismatch vs reference (f32)"

    # bf16 decoder weights for the streamed column matmul (v6e/v7x MXU path)
    out_bf16 = graphcfe_forward(features, adj, y_cf, params,
                                decoder_dtype=jnp.bfloat16)
    jax.block_until_ready(out_bf16)
    assert jnp.allclose(out_bf16['z_mu'], ref_zmu, atol=1e-3, rtol=1e-3)
    assert jnp.allclose(out_bf16['features_reconst'], ref_feat, atol=3e-1, rtol=1e-1)
    assert jnp.allclose(out_bf16['adj_reconst'], ref_adj, atol=1e-1, rtol=1e-1)

    print("KERNEL_OK")
</pallas_src>

<mosaic_0001>
module attributes {stable_mosaic.version = 11 : i64} {
  func.func @kernel(%arg0: i32, %arg1: memref<4x16x8xf32, #tpu.memory_space<vmem>>, %arg2: memref<4x16x16xf32, #tpu.memory_space<vmem>>, %arg3: memref<4x1xf32, #tpu.memory_space<vmem>>, %arg4: memref<8x32xf32, #tpu.memory_space<vmem>>, %arg5: memref<32x64xf32, #tpu.memory_space<vmem>>, %arg6: memref<32x64xf32, #tpu.memory_space<vmem>>, %arg7: memref<64x64xf32, #tpu.memory_space<vmem>>, %arg8: memref<5x64xf32, #tpu.memory_space<vmem>>, %arg9: memref<32x128xf32, #tpu.memory_space<vmem>>, %arg10: memref<1x128xf32, #tpu.memory_space<vmem>>, %arg11: memref<4x64xf32, #tpu.memory_space<vmem>>, %arg12: memref<4x128xf32, #tpu.memory_space<vmem>>, %arg13: memref<2x4x32xf32, #tpu.memory_space<vmem>>) attributes {dimension_semantics = [#tpu.dimension_semantics<arbitrary>], iteration_bounds = array<i64: 3>, scalar_prefetch = 0 : i64, scratch_operands = 1 : i64, tpu.core_type = #tpu.core_type<tc>, window_params = [{pipeline_mode = #tpu.pipeline_mode<synchronous>, transform_indices = @transform_0, window_bounds = array<i64: 4, 16, 8>}, {pipeline_mode = #tpu.pipeline_mode<synchronous>, transform_indices = @transform_1, window_bounds = array<i64: 4, 16, 16>}, {pipeline_mode = #tpu.pipeline_mode<synchronous>, transform_indices = @transform_2, window_bounds = array<i64: 4, 1>}, {pipeline_mode = #tpu.pipeline_mode<synchronous>, transform_indices = @transform_3, window_bounds = array<i64: 8, 32>}, {pipeline_mode = #tpu.pipeline_mode<synchronous>, transform_indices = @transform_4, window_bounds = array<i64: 32, 64>}, {pipeline_mode = #tpu.pipeline_mode<synchronous>, transform_indices = @transform_5, window_bounds = array<i64: 32, 64>}, {pipeline_mode = #tpu.pipeline_mode<synchronous>, transform_indices = @transform_6, window_bounds = array<i64: 64, 64>}, {pipeline_mode = #tpu.pipeline_mode<synchronous>, transform_indices = @transform_7, window_bounds = array<i64: 5, 64>}, {transform_indices = @transform_8, window_bounds = array<i64: 32, 128>}, {transform_indices = @transform_9, window_bounds = array<i64: 1, 128>}, {pipeline_mode = #tpu.pipeline_mode<synchronous>, transform_indices = @transform_10, window_bounds = array<i64: 4, 64>}, {transform_indices = @transform_11, window_bounds = array<i64: 4, 128>}]} {
    %c0_i32 = arith.constant 0 : i32
    %0 = arith.cmpi eq, %arg0, %c0_i32 : i32
    %1 = arith.extui %0 : i1 to i32
    %c0_i32_0 = arith.constant 0 : i32
    %2 = arith.cmpi ne, %1, %c0_i32_0 : i32
    scf.if %2 {
      %c0_12 = arith.constant 0 : index
      %c0_13 = arith.constant 0 : index
      %c0_14 = arith.constant 0 : index
      %21 = vector.load %arg1[%c0_12, %c0_13, %c0_14] : memref<4x16x8xf32, #tpu.memory_space<vmem>>, vector<4x16x8xf32>
      %c0_15 = arith.constant 0 : index
      %c0_16 = arith.constant 0 : index
      %c0_17 = arith.constant 0 : index
      %22 = vector.load %arg2[%c0_15, %c0_16, %c0_17] : memref<4x16x16xf32, #tpu.memory_space<vmem>>, vector<4x16x16xf32>
      %c0_18 = arith.constant 0 : index
      %c0_19 = arith.constant 0 : index
      %23 = vector.load %arg3[%c0_18, %c0_19] : memref<4x1xf32, #tpu.memory_space<vmem>>, vector<4x1xf32>
      %24 = tpu.iota {dimensions = array<i32: 0>} : vector<16x16xi32>
      %25 = tpu.iota {dimensions = array<i32: 1>} : vector<16x16xi32>
      %26 = arith.cmpi eq, %24, %25 : vector<16x16xi32>
      %27 = vector.shape_cast %26 : vector<16x16xi1> to vector<1x16x16xi1>
      %cst_20 = arith.constant 1.000000e+00 : f32
      %28 = vector.shape_cast %27 : vector<1x16x16xi1> to vector<1x16x16xi1>
      %29 = vector.broadcast %28 : vector<1x16x16xi1> to vector<4x16x16xi1>
      %30 = vector.broadcast %cst_20 : f32 to vector<4x16x16xf32>
      %31 = arith.select %29, %30, %22 : vector<4x16x16xi1>, vector<4x16x16xf32>
      %cst_21 = arith.constant dense<0.000000e+00> : vector<4x16xf32>
      %32 = vector.multi_reduction <add>, %31, %cst_21 [2] : vector<4x16x16xf32> to vector<4x16xf32>
      %cst_22 = arith.constant 1.000000e+00 : f32
      %33 = vector.broadcast %cst_22 : f32 to vector<4x16xf32>
      %34 = arith.maximumf %32, %33 : vector<4x16xf32>
      %35 = math.rsqrt %34 : vector<4x16xf32>
      %36 = vector.shape_cast %35 : vector<4x16xf32> to vector<4x16x1xf32>
      %37 = vector.broadcast %36 : vector<4x16x1xf32> to vector<4x16x16xf32>
      %38 = arith.mulf %31, %37 : vector<4x16x16xf32>
      %cst_23 = arith.constant dense<0.000000e+00> : vector<4x16xf32>
      %39 = vector.multi_reduction <add>, %38, %cst_23 [1] : vector<4x16x16xf32> to vector<4x16xf32>
      %40 = arith.mulf %39, %35 : vector<4x16xf32>
      %41 = vector.shape_cast %40 : vector<4x16xf32> to vector<4x16x1xf32>
      %42 = vector.broadcast %41 : vector<4x16x1xf32> to vector<4x16x8xf32>
      %43 = arith.mulf %42, %21 : vector<4x16x8xf32>
      %cst_24 = arith.constant dense<0.000000e+00> : vector<4x8xf32>
      %44 = vector.multi_reduction <add>, %43, %cst_24 [1] : vector<4x16x8xf32> to vector<4x8xf32>
      %c0_25 = arith.constant 0 : index
      %c0_26 = arith.constant 0 : index
      %45 = vector.load %arg4[%c0_25, %c0_26] : memref<8x32xf32, #tpu.memory_space<vmem>>, vector<8x32xf32>
      %cst_27 = arith.constant dense<0.000000e+00> : vector<4x32xf32>
      %46 = tpu.matmul %44, %45, %cst_27 {dimension_numbers = #tpu.dot_dimension_numbers<[1], [0], [0], [1], [0, 0, 1, 1], [], []>, precision = #tpu.contract_precision<fp32>} : vector<4x8xf32>, vector<8x32xf32>, vector<4x32xf32> -> vector<4x32xf32>
      %c0_28 = arith.constant 0 : index
      %c0_29 = arith.constant 0 : index
      %47 = vector.load %arg5[%c0_28, %c0_29] : memref<32x64xf32, #tpu.memory_space<vmem>>, vector<32x64xf32>
      %cst_30 = arith.constant dense<0.000000e+00> : vector<4x64xf32>
      %48 = tpu.matmul %46, %47, %cst_30 {dimension_numbers = #tpu.dot_dimension_numbers<[1], [0], [0], [1], [0, 0, 1, 1], [], []>, precision = #tpu.contract_precision<fp32>} : vector<4x32xf32>, vector<32x64xf32>, vector<4x64xf32> -> vector<4x64xf32>
      %c1_31 = arith.constant 1 : index
      %c0_32 = arith.constant 0 : index
      %49 = vector.load %arg8[%c1_31, %c0_32] : memref<5x64xf32, #tpu.memory_space<vmem>>, vector<1x64xf32>
      %50 = vector.broadcast %23 : vector<4x1xf32> to vector<4x64xf32>
      %51 = vector.broadcast %49 : vector<1x64xf32> to vector<4x64xf32>
      %52 = arith.mulf %50, %51 : vector<4x64xf32>
      %53 = arith.addf %48, %52 : vector<4x64xf32>
      %c0_33 = arith.constant 0 : index
      %c0_34 = arith.constant 0 : index
      %54 = vector.load %arg8[%c0_33, %c0_34] : memref<5x64xf32, #tpu.memory_space<vmem>>, vector<1x64xf32>
      %55 = vector.broadcast %54 : vector<1x64xf32> to vector<4x64xf32>
      %56 = arith.addf %53, %55 : vector<4x64xf32>
      %cst_35 = arith.constant 0.000000e+00 : f32
      %57 = vector.broadcast %cst_35 : f32 to vector<4x64xf32>
      %58 = arith.maximumf %56, %57 : vector<4x64xf32>
      %59 = vector.extract_strided_slice %58 {offsets = [0, 0], sizes = [4, 32], strides = [1, 1]} : vector<4x64xf32> to vector<4x32xf32>
      %60 = vector.extract_strided_slice %58 {offsets = [0, 32], sizes = [4, 32], strides = [1, 1]} : vector<4x64xf32> to vector<4x32xf32>
      %61 = arith.negf %60 : vector<4x32xf32>
      %62 = math.exp %61 : vector<4x32xf32>
      %cst_36 = arith.constant 1.000000e+00 : f32
      %63 = vector.broadcast %cst_36 : f32 to vector<4x32xf32>
      %64 = arith.addf %63, %62 : vector<4x32xf32>
      %65 = arith.divf %63, %64 : vector<4x32xf32>
      %66 = tpu.concatenate %59, %65 in 1 : vector<4x32xf32>, vector<4x32xf32> -> vector<4x64xf32>
      %c0_37 = arith.constant 0 : index
      %c0_38 = arith.constant 0 : index
      %67 = vector.load %arg11[%c0_37, %c0_38] : memref<4x64xf32, #tpu.memory_space<vmem>>, vector<4x64xf32>
      tpu.vector_store %arg11[%c0_37, %c0_38], %66 {strides = array<i32>} : memref<4x64xf32, #tpu.memory_space<vmem>>, vector<4x64xf32>,
      %c0_39 = arith.constant 0 : index
      %c0_40 = arith.constant 0 : index
      %68 = vector.load %arg6[%c0_39, %c0_40] : memref<32x64xf32, #tpu.memory_space<vmem>>, vector<32x64xf32>
      %cst_41 = arith.constant dense<0.000000e+00> : vector<4x64xf32>
      %69 = tpu.matmul %59, %68, %cst_41 {dimension_numbers = #tpu.dot_dimension_numbers<[1], [0], [0], [1], [0, 0, 1, 1], [], []>, precision = #tpu.contract_precision<fp32>} : vector<4x32xf32>, vector<32x64xf32>, vector<4x64xf32> -> vector<4x64xf32>
      %c3 = arith.constant 3 : index
      %c0_42 = arith.constant 0 : index
      %70 = vector.load %arg8[%c3, %c0_42] : memref<5x64xf32, #tpu.memory_space<vmem>>, vector<1x64xf32>
      %71 = vector.broadcast %23 : vector<4x1xf32> to vector<4x64xf32>
      %72 = vector.broadcast %70 : vector<1x64xf32> to vector<4x64xf32>
      %73 = arith.mulf %71, %72 : vector<4x64xf32>
      %74 = arith.addf %69, %73 : vector<4x64xf32>
      %c2 = arith.constant 2 : index
      %c0_43 = arith.constant 0 : index
      %75 = vector.load %arg8[%c2, %c0_43] : memref<5x64xf32, #tpu.memory_space<vmem>>, vector<1x64xf32>
      %76 = vector.broadcast %75 : vector<1x64xf32> to vector<4x64xf32>
      %77 = arith.addf %74, %76 : vector<4x64xf32>
      %cst_44 = arith.constant 0.000000e+00 : f32
      %78 = vector.broadcast %cst_44 : f32 to vector<4x64xf32>
      %79 = arith.maximumf %77, %78 : vector<4x64xf32>
      %c0_45 = arith.constant 0 : index
      %c0_46 = arith.constant 0 : index
      %80 = vector.load %arg7[%c0_45, %c0_46] : memref<64x64xf32, #tpu.memory_space<vmem>>, vector<64x64xf32>
      %cst_47 = arith.constant dense<0.000000e+00> : vector<4x64xf32>
      %81 = tpu.matmul %79, %80, %cst_47 {dimension_numbers = #tpu.dot_dimension_numbers<[1], [0], [0], [1], [0, 0, 1, 1], [], []>, precision = #tpu.contract_precision<fp32>} : vector<4x64xf32>, vector<64x64xf32>, vector<4x64xf32> -> vector<4x64xf32>
      %c4 = arith.constant 4 : index
      %c0_48 = arith.constant 0 : index
      %82 = vector.load %arg8[%c4, %c0_48] : memref<5x64xf32, #tpu.memory_space<vmem>>, vector<1x64xf32>
      %83 = vector.broadcast %82 : vector<1x64xf32> to vector<4x64xf32>
      %84 = arith.addf %81, %83 : vector<4x64xf32>
      %cst_49 = arith.constant 0.000000e+00 : f32
      %85 = vector.broadcast %cst_49 : f32 to vector<4x64xf32>
      %86 = arith.maximumf %84, %85 : vector<4x64xf32>
      %87 = vector.extract_strided_slice %86 {offsets = [0, 0], sizes = [4, 32], strides = [1, 1]} : vector<4x64xf32> to vector<4x32xf32>
      %c0_50 = arith.constant 0 : index
      %c0_51 = arith.constant 0 : index
      %c0_52 = arith.constant 0 : index
      %88 = vector.load %arg13[%c0_50, %c0_51, %c0_52] : memref<2x4x32xf32, #tpu.memory_space<vmem>>, vector<1x4x32xf32>
      %89 = vector.shape_cast %88 : vector<1x4x32xf32> to vector<4x32xf32>
      %90 = vector.shape_cast %87 : vector<4x32xf32> to vector<1x4x32xf32>
      tpu.vector_store %arg13[%c0_50, %c0_51, %c0_52], %90 {strides = array<i32>} : memref<2x4x32xf32, #tpu.memory_space<vmem>>, vector<1x4x32xf32>,
      %91 = vector.extract_strided_slice %86 {offsets = [0, 32], sizes = [4, 32], strides = [1, 1]} : vector<4x64xf32> to vector<4x32xf32>
      %c1_53 = arith.constant 1 : index
      %c0_54 = arith.constant 0 : index
      %c0_55 = arith.constant 0 : index
      %92 = vector.load %arg13[%c1_53, %c0_54, %c0_55] : memref<2x4x32xf32, #tpu.memory_space<vmem>>, vector<1x4x32xf32>
      %93 = vector.shape_cast %92 : vector<1x4x32xf32> to vector<4x32xf32>
      %94 = vector.shape_cast %91 : vector<4x32xf32> to vector<1x4x32xf32>
      tpu.vector_store %arg13[%c1_53, %c0_54, %c0_55], %94 {strides = array<i32>} : memref<2x4x32xf32, #tpu.memory_space<vmem>>, vector<1x4x32xf32>,
    } else {
    }
    %c1_i32 = arith.constant 1 : i32
    %3 = arith.cmpi slt, %arg0, %c1_i32 : i32
    %c0 = arith.constant 0 : index
    %c0_1 = arith.constant 0 : index
    %c0_2 = arith.constant 0 : index
    %4 = vector.load %arg13[%c0, %c0_1, %c0_2] : memref<2x4x32xf32, #tpu.memory_space<vmem>>, vector<1x4x32xf32>
    %5 = vector.shape_cast %4 : vector<1x4x32xf32> to vector<4x32xf32>
    %c1 = arith.constant 1 : index
    %c0_3 = arith.constant 0 : index
    %c0_4 = arith.constant 0 : index
    %6 = vector.load %arg13[%c1, %c0_3, %c0_4] : memref<2x4x32xf32, #tpu.memory_space<vmem>>, vector<1x4x32xf32>
    %7 = vector.shape_cast %6 : vector<1x4x32xf32> to vector<4x32xf32>
    %8 = arith.select %3, %5, %7 : vector<4x32xf32>
    %c0_5 = arith.constant 0 : index
    %c0_6 = arith.constant 0 : index
    %9 = vector.load %arg9[%c0_5, %c0_6] : memref<32x128xf32, #tpu.memory_space<vmem>>, vector<32x128xf32>
    %cst = arith.constant dense<0.000000e+00> : vector<4x128xf32>
    %10 = tpu.matmul %8, %9, %cst {dimension_numbers = #tpu.dot_dimension_numbers<[1], [0], [0], [1], [0, 0, 1, 1], [], []>, precision = #tpu.contract_precision<fp32>} : vector<4x32xf32>, vector<32x128xf32>, vector<4x128xf32> -> vector<4x128xf32>
    %c0_7 = arith.constant 0 : index
    %c0_8 = arith.constant 0 : index
    %11 = vector.load %arg10[%c0_7, %c0_8] : memref<1x128xf32, #tpu.memory_space<vmem>>, vector<1x128xf32>
    %12 = vector.broadcast %11 : vector<1x128xf32> to vector<4x128xf32>
    %13 = arith.addf %10, %12 : vector<4x128xf32>
    %14 = arith.negf %13 : vector<4x128xf32>
    %15 = math.exp %14 : vector<4x128xf32>
    %cst_9 = arith.constant 1.000000e+00 : f32
    %16 = vector.broadcast %cst_9 : f32 to vector<4x128xf32>
    %17 = arith.addf %16, %15 : vector<4x128xf32>
    %18 = arith.divf %16, %17 : vector<4x128xf32>
    %19 = arith.select %3, %13, %18 : vector<4x128xf32>
    %c0_10 = arith.constant 0 : index
    %c0_11 = arith.constant 0 : index
    %20 = vector.load %arg12[%c0_10, %c0_11] : memref<4x128xf32, #tpu.memory_space<vmem>>, vector<4x128xf32>
    tpu.vector_store %arg12[%c0_10, %c0_11], %19 {strides = array<i32>} : memref<4x128xf32, #tpu.memory_space<vmem>>, vector<4x128xf32>,
    return
  }
  func.func @transform_0(%arg0: i32) -> (i32, i32, i32) {
    %c0_i32 = arith.constant 0 : i32
    %c0_i32_0 = arith.constant 0 : i32
    %c0_i32_1 = arith.constant 0 : i32
    %c0_i32_2 = arith.constant 0 : i32
    return %c0_i32, %c0_i32_0, %c0_i32_1 : i32, i32, i32
  }
  func.func @transform_1(%arg0: i32) -> (i32, i32, i32) {
    %c0_i32 = arith.constant 0 : i32
    %c0_i32_0 = arith.constant 0 : i32
    %c0_i32_1 = arith.constant 0 : i32
    %c0_i32_2 = arith.constant 0 : i32
    return %c0_i32, %c0_i32_0, %c0_i32_1 : i32, i32, i32
  }
  func.func @transform_2(%arg0: i32) -> (i32, i32) {
    %c0_i32 = arith.constant 0 : i32
    %c0_i32_0 = arith.constant 0 : i32
    %c0_i32_1 = arith.constant 0 : i32
    return %c0_i32, %c0_i32_0 : i32, i32
  }
  func.func @transform_3(%arg0: i32) -> (i32, i32) {
    %c0_i32 = arith.constant 0 : i32
    %c0_i32_0 = arith.constant 0 : i32
    %c0_i32_1 = arith.constant 0 : i32
    return %c0_i32, %c0_i32_0 : i32, i32
  }
  func.func @transform_4(%arg0: i32) -> (i32, i32) {
    %c0_i32 = arith.constant 0 : i32
    %c0_i32_0 = arith.constant 0 : i32
    %c0_i32_1 = arith.constant 0 : i32
    return %c0_i32, %c0_i32_0 : i32, i32
  }
  func.func @transform_5(%arg0: i32) -> (i32, i32) {
    %c0_i32 = arith.constant 0 : i32
    %c0_i32_0 = arith.constant 0 : i32
    %c0_i32_1 = arith.constant 0 : i32
    return %c0_i32, %c0_i32_0 : i32, i32
  }
  func.func @transform_6(%arg0: i32) -> (i32, i32) {
    %c0_i32 = arith.constant 0 : i32
    %c0_i32_0 = arith.constant 0 : i32
    %c0_i32_1 = arith.constant 0 : i32
    return %c0_i32, %c0_i32_0 : i32, i32
  }
  func.func @transform_7(%arg0: i32) -> (i32, i32) {
    %c0_i32 = arith.constant 0 : i32
    %c0_i32_0 = arith.constant 0 : i32
    %c0_i32_1 = arith.constant 0 : i32
    return %c0_i32, %c0_i32_0 : i32, i32
  }
  func.func @transform_8(%arg0: i32) -> (i32, i32) {
    %c0_i32 = arith.constant 0 : i32
    %c0_i32_0 = arith.constant 0 : i32
    return %c0_i32, %arg0 : i32, i32
  }
  func.func @transform_9(%arg0: i32) -> (i32, i32) {
    %c0_i32 = arith.constant 0 : i32
    %c0_i32_0 = arith.constant 0 : i32
    return %c0_i32, %arg0 : i32, i32
  }
  func.func @transform_10(%arg0: i32) -> (i32, i32) {
    %c0_i32 = arith.constant 0 : i32
    %c0_i32_0 = arith.constant 0 : i32
    %c0_i32_1 = arith.constant 0 : i32
    return %c0_i32, %c0_i32_0 : i32, i32
  }
  func.func @transform_11(%arg0: i32) -> (i32, i32) {
    %c0_i32 = arith.constant 0 : i32
    %c0_i32_0 = arith.constant 0 : i32
    return %c0_i32, %arg0 : i32, i32
  }
}

</mosaic_0001>

<bundles_post_ra>
// kernel: tpu_custom_call.1
= control target key start
LH: loop header
LB: loop body
LE: loop exit
PB: predicated region body
PF: predicated region fallthrough
CT: control target
= control target key end

     0   :  { %17 = vsyncpa [#allocation4], 0  ;;  %s5263_s0 = inlined_call_operand.vmem [shape: f32[4,16,8], index: 0, kind: input, shape index: {}]   ;;  %s5264_s1 = inlined_call_operand.hbm [shape: f32[4,16,16], index: 1, kind: input, shape index: {}]   ;;  %s5265_s2 = inlined_call_operand.vmem [shape: f32[4,1], index: 2, kind: input, shape index: {}]   ;;  %s5266_s3 = inlined_call_operand.vmem [shape: f32[8,32], index: 3, kind: input, shape index: {}]   ;;  %s5267_s4 = inlined_call_operand.hbm [shape: f32[32,64], index: 4, kind: input, shape index: {}]   ;;  %s5268_s5 = inlined_call_operand.hbm [shape: f32[32,64], index: 5, kind: input, shape index: {}]   ;;  %s5269_s6 = inlined_call_operand.hbm [shape: f32[64,64], index: 6, kind: input, shape index: {}]   ;;  %s5270_s7 = inlined_call_operand.vmem [shape: f32[5,64], index: 7, kind: input, shape index: {}]   ;;  %s5271_s8 = inlined_call_operand.vmem [shape: f32[32,384], index: 8, kind: input, shape index: {}]   ;;  %s5272_s9 = inlined_call_operand.vmem [shape: f32[1,384], index: 9, kind: input, shape index: {}]   ;;  %s5273_s10 = inlined_call_operand.hbm [shape: f32[4,64], index: 10, kind: output, shape index: {0}]   ;;  %s5274_s11 = inlined_call_operand.hbm [shape: f32[4,384], index: 11, kind: output, shape index: {1}]  }
   0x1   :  { %18 = vsyncpa [#allocation7], 0 }
   0x2   :  { %19 = vsyncpa [#allocation10], 0 }
   0x3   :  { %20 = vsyncpa [#allocation5], 0 }
   0x4   :  { %21 = vsyncpa [#allocation14], 0 }
   0x5   :  { %23 = vsyncpa [#allocation14 + $0x1], 0  ;;  %s4417_s17 = smov 0   ;;  %s4419_s18 = smov 0  }
   0x6   :  { %s4421_s19 = smov 0   ;;  %s4423_s20 = smov 0  }
   0x7 LB: > { %s4438_s21 = sadd.s32 4294967295, %s4341_s20   ;;  %s3488_s22 = sadd.s32 4294967294, %s4341_s20   ;;  %s4341_s20 = sphi %s4423_s20, %s5302_s20   ;;  %s4337_s19 = sphi %s4421_s19, %s5306_s19   ;;  %s4333_s18 = sphi %s4419_s18, %s5305_s18   ;;  %s4329_s17 = sphi %s4417_s17, %s5304_s17  }
   0x8   : > { %s4442_s23 = sadd.s32 1, %s4341_s20   ;;  %s204_s24 = sadd.s32 1, %s4337_s19 }
   0x9   : > { %5280 = sst [smem:[#allocation20_spill]] %s4442_s23  ;;  %s201_s25 = ssub.s32 %s4341_s20, %s4442_s23 }
   0xa   : > { %p211_p0 = scmp.ne.s32.totalorder %s4337_s19, %s4333_s18  ;;  %p202_p1 = scmp.eq.s32.totalorder %s201_s25, 0 }
   0xb   : > { %p212_p2 = scmp.eq.s32.totalorder %s4341_s20, 0  ;;  %p5275_p3 = scmp.eq.s32.totalorder %s4438_s21, 2 }
   0xc   : > { %p293_p4 = scmp.ne.s32.totalorder %s4333_s18, %s4329_s17  ;;  %p294_p7 = scmp.eq.s32.totalorder %s3488_s22, 2 }
   0xd   : > { %s4454_s26 = scalar_select %p202_p1, %s4337_s19, %s204_s24  }
   0xe   : > { %p4456_p5 = por %p212_p2, %p211_p0  ;;  %p4462_p6 = por %p5275_p3, %p211_p0 }
   0xf   : > { %5281 = sst [smem:[#allocation21_spill]] %s4454_s26  ;;  %p3489_p8 = scmp.ge.s32.totalorder %s4341_s20, 1 }
  0x10   : > { %p301_p9 = scmp.lt.s32.totalorder %s4341_s20, 4  ;;  %p4469_p11 = por %p294_p7, %p293_p4 }
  0x11   : > { %p5279_p12 = scmp.eq.s32.totalorder %s4438_s21, 0  ;;  %s4343_s12 = smov [#allocation6]  }
  0x12   : > { %s5284_s29 = scalar_select %p4469_p11, 1, 0 }
  0x13   : > { %p4474_p13 = pnand %p3489_p8, %p301_p9  ;;  %s335_s13 = sshll.u32 %s4343_s12, 4  ;;  %s336_s13 = int_to_ptr.vmem [resolvable:$true] %s335_s13 }
  0x14   : > { %5285 = sst [smem:[#allocation22_spill]] %s5284_s29  ;;  %s4344_s15 = smov [#allocation3]  }
  0x15   : > { %p4039_p1 = pneg %p4474_p13  ;;  %s316_s16 = sshll.u32 %s4344_s15, 4  ;;  %s317_s16 = int_to_ptr.vmem [resolvable:$true] %s316_s16 }
  0x16   : > { %s4345_s22 = smov [#allocation8]   ;;  %s4148_s25 = scalar_lea.vmem %s336_s13, 512 }
  0x17   : > { %p4482_p0 = pnand %p5279_p12, %p4039_p1  ;;  %s348_s24 = sshll.u32 %s4345_s22, 4  ;;  %s349_s24 = int_to_ptr.vmem [resolvable:$true] %s348_s24 }
  0x18   : > { %p4149_p4 = scmp.ne.s32.totalorder %s336_s13, %s4148_s25  ;;  %p4156_p9 = scmp.lt.s32.totalorder %s336_s13, %s336_s13 }
  0x19   : > { %p4139_p2 = pneg %p4482_p0  ;;  %p4157_p1 = scmp.lt.s32.totalorder %s4148_s25, %s4148_s25 }
  0x1b   : > { %p4151_p7 = pnand %p4149_p4, %p4139_p2  ;;  %p4158_p3 = por %p4157_p1, %p4156_p9 }
  0x1d   : > { %p4152_p8 = pneg %p4151_p7 }
  0x1f   : > { %p4159_p10 = pnand %p4158_p3, %p4152_p8 }
  0x21   : > { %4162 = shalt.err (!%p4159_p10)
}
  0x22   : > { %s4346_s12 = smov 128   ;;  %s4347_s15 = smov 8  }
  0x23   : > { %4045 = dma.hbm_to_vmem [thread:$0]  (!%p4482_p0), %s5267_s4, 512, %s336_s13, [#allocation7], %s4346_s12, %s4346_s12, %s4347_s15  }
  0x24   : > { %s4174_s23 = scalar_lea.vmem %s317_s16, 1024  ;;  %p4182_p3 = scmp.lt.s32.totalorder %s317_s16, %s317_s16 }
  0x25   : > { %p4175_p4 = scmp.ne.s32.totalorder %s317_s16, %s4174_s23  ;;  %p4183_p10 = scmp.lt.s32.totalorder %s4174_s23, %s4174_s23 }
  0x27   : > { %p4177_p7 = pnand %p4175_p4, %p4139_p2  ;;  %p4184_p8 = por %p4183_p10, %p4182_p3 }
  0x29   : > { %p4178_p9 = pneg %p4177_p7 }
  0x2b   : > { %p4185_p1 = pnand %p4184_p8, %p4178_p9 }
  0x2d   : > { %4188 = shalt.err (!%p4185_p1)
}
  0x2e   : > { %4042 = dma.hbm_to_vmem [thread:$0]  (!%p4482_p0), %s5264_s1, 1024, %s317_s16, [#allocation4], %s4346_s12, %s4346_s12, %s4347_s15  }
  0x2f   : > { %s4200_s26 = scalar_lea.vmem %s349_s24, 512  ;;  %p4208_p3 = scmp.lt.s32.totalorder %s349_s24, %s349_s24 }
  0x30   : > { %p4201_p12 = scmp.ne.s32.totalorder %s349_s24, %s4200_s26  ;;  %p4209_p9 = scmp.lt.s32.totalorder %s4200_s26, %s4200_s26 }
  0x32   : > { %p4203_p4 = pnand %p4201_p12, %p4139_p2  ;;  %p4210_p10 = por %p4209_p9, %p4208_p3 }
  0x34   : > { %p4204_p7 = pneg %p4203_p4 }
  0x36   : > { %p4211_p8 = pnand %p4210_p10, %p4204_p7 }
  0x38   : > { %4214 = shalt.err (!%p4211_p8)
}
  0x39   : > { %4048 = dma.hbm_to_vmem [thread:$0]  (!%p4482_p0), %s5268_s5, 512, %s349_s24, [#allocation7], %s4346_s12, %s4346_s12, %s4347_s15  }
  0x3a   : > { %s4348_s13 = smov [#allocation9]  }
  0x3b   : > { %s361_s16 = sshll.u32 %s4348_s13, 4  ;;  %s362_s16 = int_to_ptr.vmem [resolvable:$true] %s361_s16 }
  0x3c   : > { %s4226_s22 = scalar_lea.vmem %s362_s16, 1024  ;;  %p4234_p7 = scmp.lt.s32.totalorder %s362_s16, %s362_s16 }
  0x3d   : > { %p4227_p12 = scmp.ne.s32.totalorder %s362_s16, %s4226_s22  ;;  %p4235_p3 = scmp.lt.s32.totalorder %s4226_s22, %s4226_s22 }
  0x3f   : > { %p4229_p1 = pnand %p4227_p12, %p4139_p2  ;;  %p4236_p9 = por %p4235_p3, %p4234_p7 }
  0x41   : > { %p4230_p4 = pneg %p4229_p1 }
  0x43   : > { %p4237_p10 = pnand %p4236_p9, %p4230_p4 }
  0x45   : > { %4240 = shalt.err (!%p4237_p10)
}
  0x46   : > { %4051 = dma.hbm_to_vmem [thread:$0]  (!%p4482_p0), %s5269_s6, 1024, %s362_s16, [#allocation10], %s4346_s12, %s4346_s12, %s4347_s15  }
  0x47   : > { %p3494_p8 = scmp.ge.s32.totalorder %s4341_s20, 3 }
  0x49   : > { %374 = sbr.rel (%p3494_p8) target bundleno = 84 (0x54), region = 48 }
  0x4e   : > { %377 = sbr.rel (!%p4456_p5) target bundleno = 84 (0x54), region = 52  ;;  %s379_s26 = sand.u32 (%p4456_p5), 1, %s4337_s19  }
  0x4f   : > { %s3496_s23 = sshll.u32 (%p4456_p5), %s4341_s20, 3  ;;  %s3495_s29 = sshll.u32 (%p4456_p5), %s379_s26, 5 }
  0x50   : > { %s383_s22 = scalar_lea.vmem (%p4456_p5), %s5271_s8, %s3496_s23  ;;  %s381_s24 = scalar_lea.vmem (%p4456_p5), [#allocation11], %s3495_s29 }
  0x51   : > { %v418_v0 = vld [vmem:[%s383_s22] sm:$0xff] (%p4456_p5)  ;;  %v420_v1 = vld [vmem:[%s383_s22 + $0x18] sm:$0xff] (%p4456_p5)  ;;  %v422_v2 = vld [vmem:[%s383_s22 + $0x30] sm:$0xff] (%p4456_p5) }
  0x52   : > { %419 = vst [vmem:[%s381_s24] sm:$0xff] (%p4456_p5), %v418_v0  ;;  %421 = vst [vmem:[%s381_s24 + $0x8] sm:$0xff] (%p4456_p5), %v420_v1  ;;  %v424_v3 = vld [vmem:[%s383_s22 + $0x48] sm:$0xff] (%p4456_p5) }
  0x53   : > { %423 = vst [vmem:[%s381_s24 + $0x10] sm:$0xff] %v422_v2  ;;  %425 = vst [vmem:[%s381_s24 + $0x18] sm:$0xff] %v424_v3 }
  0x54 PF: > { %440 = sbr.rel (%p4474_p13) target bundleno = 1768 (0x6e8), region = 94  ;;  %p5288_p5 = scmp.eq.s32.totalorder (!%p4474_p13), %s4438_s21, 0 }
  0x59   : > { %4308 = dma.done.wait (%p5288_p5), [#allocation4], 1024   ;;  %p5289_p0 = pmov %p5288_p5 }
  0x5b   : > { %4310 = vsyncadd (%p5289_p0), [#allocation4], 4294966272  ;;  %p5290_p2 = pmov %p5289_p0 }
  0x5c   : > { %p5291_p12 = pmov %p5289_p0 }
  0x5d   : > { %4312 = dma.done.wait (%p5290_p2), [#allocation7], 1024  }
  0x5e   : > { %4314 = vsyncadd (%p5291_p12), [#allocation7], 4294966272  ;;  %p5292_p1 = pmov %p5289_p0 }
  0x5f   : > { %p5293_p4 = pmov %p5289_p0 }
  0x60   : > { %4316 = dma.done.wait (%p5292_p1), [#allocation10], 1024  }
  0x61   : > { %4318 = vsyncadd (%p5293_p4), [#allocation10], 4294966272  ;;  %s4555_s27 = sand.u32 1, %s4333_s18   ;;  %p501_p13 = scmp.lt.s32.totalorder %s4438_s21, 2 }
  0x62   : > { %s3502_s30 = sshll.u32 %s4555_s27, 5  ;;  %s3503_s12 = sshll.u32 %s4555_s27, 2 }
  0x63   : > { %s4561_s15 = scalar_select %p501_p13, %s4438_s21, 2 }
  0x64   : > { %s4567_s23 = scalar_lea.vmem [#allocation11], %s3502_s30  ;;  %s4569_s29 = scalar_lea.vmem [#allocation13], %s3503_s12 }
  0x65   : > { %s503_s26 = scalar_lea.vmem %s5272_s9, %s4561_s15  ;;  %p5294_p7 = scmp.ne.s32.totalorder %s4438_s21, 0 }
  0x66   : > { %s4352_s16 = smov (!%p5294_p7), 96  }
  0x67   : > { %507 = sbr.rel (%p5294_p7) target bundleno = 1484 (0x5cc), region = 118 }
  0x6c   : > { %v525_v4 = vlaneseq  ;;  %v518_v5 = vld [vmem:[#allocation3 + $0x10] sm:$0xff]  ;;  %v516_v8 = vld [vmem:[#allocation3] sm:$0xff]  ;;  %vm544_vm0 = vcmask 130048   ;;  %v519_v10 = vld [vmem:[#allocation3 + $0x18] sm:$0xff]  ;;  %vm646_vm3 = vcmask 130112   ;;  %vm4350_vm4 = vmmov 0  }
  0x6d   : > { %v520_v9 = vld [vmem:[#allocation3 + $0x20] sm:$0xff]  ;;  %v521_v17 = vld [vmem:[#allocation3 + $0x28] sm:$0xff]  ;;  %v523_v24 = vld [vmem:[#allocation3 + $0x38] sm:$0xff]  ;;  %vm735_vm5 = vcmask 64512   ;;  %vm777_vm6 = vcmask 1041409   ;;  %vm779_vm7 = vcmask 1042434  }
  0x6e   : > { %v4573_v6 = vshrl.u32 %v525_v4, 7  ;;  %v529_v7 = vand.u32 127, %v525_v4  ;;  %v517_v18 = vld [vmem:[#allocation3 + $0x8] sm:$0xff]  ;;  %v522_v25 = vld [vmem:[#allocation3 + $0x30] sm:$0xff]  ;;  %vm781_vm8 = vcmask 1043459   ;;  %vm1246_vm9 = vcmask 261120  }
  0x6f   : > { %vm1749_vm10 = vcmask 519168   ;;  %vm2269_vm11 = vcmask 523264   ;;  %vm2811_vm12 = vcmask 257024  }
  0x70   : > { %vm530_vm1 = vcmp.eq.s32.totalorder %v4573_v6, %v529_v7  ;;  %v527_v11 = vadd.s32 8, %v4573_v6  ;;  %v4610_v32 = vsub.s32 %v529_v7, %v4573_v6  ;;  %v641_v33 = vadd.s32 4294967288, %v529_v7 }
  0x71   : > { %v538_v12 = vsel %vm530_vm1, 1.0, %v518_v5  ;;  %v4581_v13 = vsel %vm530_vm1, 1.0, %v516_v8  ;;  %v4585_v14 = vsel %vm530_vm1, 1.0, %v520_v9  ;;  %v4603_v29 = vsel %vm530_vm1, 1.0, %v522_v25 }
  0x72   : > { %v551_v15 = vsel %vm544_vm0, %v538_v12, 0.0  ;;  %v545_v16 = vsel %vm544_vm0, %v4581_v13, 0.0  ;;  %vm531_vm2 = vcmp.eq.s32.totalorder %v527_v11, %v529_v7  ;;  %v557_v21 = vsel %vm544_vm0, %v4585_v14, 0.0 }
  0x73   : > { %552 = vadd.xlane.f32.xlu1 %v551_v15  ;;  %546 = vadd.xlane.f32.xlu0 %v545_v16  ;;  %v539_v19 = vsel %vm531_vm2, 1.0, %v519_v10  ;;  %v541_v22 = vsel %vm531_vm2, 1.0, %v521_v17  ;;  %v537_v23 = vsel %vm531_vm2, 1.0, %v517_v18  ;;  %v4599_v28 = vsel %vm531_vm2, 1.0, %v523_v24 }
  0x74   : > { %v554_v20 = vsel %vm544_vm0, %v539_v19, 0.0  ;;  %v560_v26 = vsel %vm544_vm0, %v541_v22, 0.0  ;;  %v548_v27 = vsel %vm544_vm0, %v537_v23, 0.0  ;;  %v566_v30 = vsel %vm544_vm0, %v4599_v28, 0.0 }
  0x75   : > { %v563_v31 = vsel %vm544_vm0, %v4603_v29, 0.0  ;;  %v4613_v34 = vsub.s32 %v641_v33, %v4573_v6 }
  0x77   : > { %555 = vadd.xlane.f32.xlu1 %v554_v20  ;;  %558 = vadd.xlane.f32.xlu0 %v557_v21 }
  0x7b   : > { %561 = vadd.xlane.f32.xlu1 %v560_v26  ;;  %549 = vadd.xlane.f32.xlu0 %v548_v27 }
  0x7f   : > { %567 = vadd.xlane.f32.xlu1 %v566_v30  ;;  %564 = vadd.xlane.f32.xlu0 %v563_v31 }
  0xfc   : > { %v553_v35 = vpop.xlane.xlu1 %552  ;;  %v547_v36 = vpop.xlane.xlu0 %546 }
  0xfd   : > { %v571_v37 = vmax.f32 %v553_v35, 1.0  ;;  %v569_v38 = vmax.f32 %v547_v36, 1.0 }
  0xff   : > { %4113 = vrsqrt.f32 %v571_v37 }
 0x100   : > { %v556_v39 = vpop.xlane.xlu1 %555  ;;  %v559_v40 = vpop.xlane.xlu0 %558  ;;  %4115 = vrsqrt.f32 %v569_v38 }
 0x101   : > { %v572_v41 = vmax.f32 %v556_v39, 1.0  ;;  %v573_v42 = vmax.f32 %v559_v40, 1.0 }
 0x103   : > { %4117 = vrsqrt.f32 %v572_v41 }
 0x104   : > { %4119 = vrsqrt.f32 %v573_v42  ;;  %v562_v43 = vpop.xlane.xlu1 %561  ;;  %v550_v44 = vpop.xlane.xlu0 %549  ;;  %v685_v42 = vsub.s32 0, %v4573_v6 }
 0x105   : > { %v574_v45 = vmax.f32 %v562_v43, 1.0  ;;  %v570_v46 = vmax.f32 %v550_v44, 1.0 }
 0x107   : > { %4121 = vrsqrt.f32 %v574_v45 }
 0x108   : > { %4123 = vrsqrt.f32 %v570_v46  ;;  %v568_v47 = vpop.xlane.xlu1 %567  ;;  %v565_v48 = vpop.xlane.xlu0 %564 }
 0x109   : > { %v576_v49 = vmax.f32 %v568_v47, 1.0  ;;  %v575_v50 = vmax.f32 %v565_v48, 1.0 }
 0x10b   : > { %4125 = vrsqrt.f32 %v576_v49 }
 0x10c   : > { %v4114_v51 = vpop.eup %4113  ;;  %4127 = vrsqrt.f32 %v575_v50 }
 0x10d   : > { %v587_v52 = vmul.f32 %v4114_v51, %v538_v12  ;;  %v4116_v53 = vpop.eup %4115  ;;  %v651_v54 = vrot.slane %v4114_v51, %v4610_v32 }
 0x10e   : > { %v585_v60 = vmul.f32 %v4116_v53, %v4581_v13  ;;  %v640_v8 = vrot.slane %v4116_v53, %v4610_v32 }
 0x10f   : > { %v602_v58 = vsel %vm544_vm0, %v587_v52, 0.0 }
 0x110   : > { %v4118_v55 = vpop.eup %4117  ;;  %v593_v11 = vsel %vm544_vm0, %v585_v60, 0.0  ;;  %v772_v60 = vld [vmem:[%s5266_s3] sm:$0xff] }
 0x111   : > { %v4120_v56 = vpop.eup %4119  ;;  %v588_v57 = vmul.f32 %v4118_v55, %v539_v19  ;;  %v655_v59 = vrot.slane %v4118_v55, %v4613_v34 }
 0x112   : > { %v589_v63 = vmul.f32 %v4120_v56, %v4585_v14  ;;  %v660_v4 = vrot.slane %v4120_v56, %v4610_v32 }
 0x113   : > { %v603_v61 = vsel %vm544_vm0, %v588_v57, 0.0  ;;  %v656_v62 = vsel %vm646_vm3, %v655_v59, %v651_v54 }
 0x114   : > { %v4122_v0 = vpop.eup %4121  ;;  %v604_v1 = vadd.f32 %v603_v61, %v602_v58  ;;  %v611_v12 = vsel %vm544_vm0, %v589_v63, 0.0  ;;  %v4643_v61 = vand.u32 4294901760, %v772_v60 }
 0x115   : > { %v4124_v2 = vpop.eup %4123  ;;  %v590_v3 = vmul.f32 %v4122_v0, %v541_v22  ;;  %v664_v5 = vrot.slane %v4122_v0, %v4613_v34  ;;  %v4349_v0 = vmov 0.0  }
 0x116   : > { %v586_v7 = vmul.f32 %v4124_v2, %v537_v23  ;;  %v645_v9 = vrot.slane %v4124_v2, %v4613_v34  ;;  %v605_v10 = vrot.slane %v604_v1, 4  ;;  %3680 = vmatprep.subr.mxu1 %v4349_v0  ;;  %3682 = vmatprep.mubr.msk.f32.mxu1 %vm4350_vm4, %v4349_v0 }
 0x117   : > { %v612_v13 = vsel %vm544_vm0, %v590_v3, 0.0  ;;  %v665_v14 = vsel %vm646_vm3, %v664_v5, %v660_v4  ;;  %3675 = vmatprep.subr.mxu0 %v4349_v0  ;;  %3677 = vmatprep.mubr.msk.f32.mxu0 %vm4350_vm4, %v4349_v0  ;;  %v509_v3 = vld [vmem:[%s5263_s0 + $0x8] sm:$0xff]  ;;  %v508_v4 = vld [vmem:[%s5263_s0] sm:$0xff] }
 0x118   : > { %v4126_v15 = vpop.eup %4125  ;;  %v594_v16 = vsel %vm544_vm0, %v586_v7, 0.0  ;;  %v647_v17 = vsel %vm646_vm3, %v645_v9, %v640_v8  ;;  %v606_v18 = vadd.f32 %v605_v10, %v604_v1  ;;  %v613_v19 = vadd.f32 %v612_v13, %v611_v12  ;;  %3676 = vmatpush3.msra.mxu0 %v4643_v61  ;;  %v510_v13 = vld [vmem:[%s5263_s0 + $0x10] sm:$0xff] }
 0x119   : > { %v4128_v20 = vpop.eup %4127  ;;  %v595_v21 = vadd.f32 %v594_v16, %v593_v11  ;;  %v592_v22 = vmul.f32 %v4126_v15, %v4599_v28  ;;  %v673_v23 = vrot.slane %v4126_v15, %v4613_v34  ;;  %3685 = vmatprep.subr.mxu0 %v4349_v0  ;;  %v511_v16 = vld [vmem:[%s5263_s0 + $0x18] sm:$0xff] }
 0x11a   : > { %v607_v24 = vrot.slane %v606_v18, 2  ;;  %v614_v25 = vrot.slane %v613_v19, 4  ;;  %v591_v26 = vmul.f32 %v4128_v20, %v4603_v29  ;;  %v669_v27 = vrot.slane %v4128_v20, %v4610_v32 }
 0x11b   : > { %v596_v30 = vrot.slane %v595_v21, 4  ;;  %v621_v31 = vsel %vm544_vm0, %v592_v22, 0.0  ;;  %v513_v22 = vld [vmem:[%s5263_s0 + $0x28] sm:$0xff] }
 0x11c   : > { %v608_v33 = vadd.f32 %v607_v24, %v606_v18  ;;  %v615_v35 = vadd.f32 %v614_v25, %v613_v19  ;;  %v620_v36 = vsel %vm544_vm0, %v591_v26, 0.0  ;;  %v674_v37 = vsel %vm646_vm3, %v673_v23, %v669_v27  ;;  %v512_v18 = vld [vmem:[%s5263_s0 + $0x20] sm:$0xff] }
 0x11d   : > { %v597_v38 = vadd.f32 %v596_v30, %v595_v21  ;;  %v622_v39 = vadd.f32 %v621_v31, %v620_v36  ;;  %v514_v30 = vld [vmem:[%s5263_s0 + $0x30] sm:$0xff] }
 0x11e   : > { %v609_v28 = vrot.slane %v608_v33, 1  ;;  %v616_v40 = vrot.slane %v615_v35, 2 }
 0x11f   : > { %v598_v34 = vrot.slane %v597_v38, 2  ;;  %v623_v41 = vrot.slane %v622_v39, 4 }
 0x120   : > { %v610_v29 = vadd.f32 %v609_v28, %v608_v33  ;;  %v617_v43 = vadd.f32 %v616_v40, %v615_v35 }
 0x121   : > { %v599_v32 = vadd.f32 %v598_v34, %v597_v38  ;;  %v624_v44 = vadd.f32 %v623_v41, %v622_v39 }
 0x122   : > { %v680_v45 = vmul.f32 %v656_v62, %v610_v29  ;;  %v618_v46 = vrot.slane %v617_v43, 1  ;;  %v4646_v62 = vsub.f32 %v772_v60, %v4643_v61 }
 0x123   : > { %v600_v47 = vrot.slane %v599_v32, 1  ;;  %v625_v48 = vrot.slane %v624_v44, 2 }
 0x124   : > { %v697_v49 = vrot.slane %v680_v45, %v685_v42  ;;  %v619_v50 = vadd.f32 %v618_v46, %v617_v43  ;;  %v894_v63 = vand.u32 4294901760, %v4646_v62 }
 0x125   : > { %v601_v51 = vadd.f32 %v600_v47, %v599_v32  ;;  %v626_v52 = vadd.f32 %v625_v48, %v624_v44 }
 0x126   : > { %v681_v53 = vmul.f32 %v665_v14, %v619_v50  ;;  %v895_v1 = vsub.f32 %v4646_v62, %v894_v63 }
 0x127   : > { %v679_v54 = vmul.f32 %v647_v17, %v601_v51  ;;  %v627_v55 = vrot.slane %v626_v52, 1 }
 0x128   : > { %v708_v56 = vrot.slane %v681_v53, %v685_v42  ;;  %v896_v2 = vand.u32 4294901760, %v895_v1 }
 0x129   : > { %v686_v57 = vrot.slane %v679_v54, %v685_v42  ;;  %v628_v58 = vadd.f32 %v627_v55, %v626_v52 }
 0x12a   : > { %3681 = vmatpush3.msra.mxu1 %v896_v2 }
 0x12b   : > { %692 = vbcast.lane.b32.xlu1 %v686_v57, 264  ;;  %688 = vbcast.lane.b32.xlu0 %v686_v57, 256  ;;  %v682_v6 = vmul.f32 %v674_v37, %v628_v58  ;;  %v515_v37 = vld [vmem:[%s5263_s0 + $0x38] sm:$0xff] }
 0x12c   : > { %3690 = vmatprep.subr.mxu1 %v4349_v0 }
 0x12d   : > { %v719_v59 = vrot.slane %v682_v6, %v685_v42 }
 0x12f   : > { %699 = vbcast.lane.b32.xlu1 %v697_v49, 256  ;;  %710 = vbcast.lane.b32.xlu0 %v708_v56, 256 }
 0x133   : > { %703 = vbcast.lane.b32.xlu1 %v697_v49, 264  ;;  %721 = vbcast.lane.b32.xlu0 %v719_v59, 256 }
 0x137   : > { %714 = vbcast.lane.b32.xlu1 %v708_v56, 264 }
 0x13b   : > { %725 = vbcast.lane.b32.xlu1 %v719_v59, 264 }
 0x19d   : > { %v693_v5 = vpop.permute.xlu1 %692  ;;  %v689_v7 = vpop.permute.xlu0 %688 }
 0x19e   : > { %v728_v8 = vmul.f32 %v693_v5, %v509_v3  ;;  %v727_v9 = vmul.f32 %v689_v7, %v508_v4 }
 0x1a0   : > { %v737_v10 = vsel %vm735_vm5, %v728_v8, 0.0  ;;  %v736_v11 = vsel %vm735_vm5, %v727_v9, 0.0 }
 0x1a1   : > { %v700_v12 = vpop.permute.xlu1 %699  ;;  %v738_v14 = vadd.f32 %v737_v10, %v736_v11  ;;  %v711_v15 = vpop.permute.xlu0 %710 }
 0x1a2   : > { %v729_v17 = vmul.f32 %v700_v12, %v510_v13  ;;  %v731_v24 = vmul.f32 %v711_v15, %v512_v18 }
 0x1a3   : > { %v739_v21 = vrot.slane %v738_v14, 4 }
 0x1a4   : > { %v745_v23 = vsel %vm735_vm5, %v729_v17, 0.0  ;;  %v754_v38 = vsel %vm735_vm5, %v731_v24, 0.0 }
 0x1a5   : > { %v704_v19 = vpop.permute.xlu1 %703  ;;  %v722_v27 = vpop.permute.xlu0 %721  ;;  %v740_v35 = vadd.f32 %v739_v21, %v738_v14  ;;  %v1233_v14 = vld [vmem:[#allocation6 + $0x10] sm:$0xff] }
 0x1a6   : > { %v730_v20 = vmul.f32 %v704_v19, %v511_v16  ;;  %v733_v39 = vmul.f32 %v722_v27, %v514_v30  ;;  %v4720_v16 = vand.u32 4294901760, %v1233_v14  ;;  %v1231_v19 = vld [vmem:[#allocation6] sm:$0xff] }
 0x1a7   : > { %v741_v29 = vrot.slane %v740_v35, 2 }
 0x1a8   : > { %v746_v25 = vsel %vm735_vm5, %v730_v20, 0.0  ;;  %v763_v44 = vsel %vm735_vm5, %v733_v39, 0.0  ;;  %v4726_v17 = vsub.f32 %v1233_v14, %v4720_v16  ;;  %v4351_v39 = vmov 0  }
 0x1a9   : > { %v747_v26 = vadd.f32 %v746_v25, %v745_v23  ;;  %v715_v31 = vpop.permute.xlu1 %714  ;;  %v742_v49 = vadd.f32 %v741_v29, %v740_v35  ;;  %v4739_v23 = vand.u32 4294901760, %v1231_v19  ;;  %4112 = vset.pattern.permute.xlu0 %v4351_v39 }
 0x1aa   : > { %v732_v33 = vmul.f32 %v715_v31, %v513_v22  ;;  %v1363_v21 = vand.u32 4294901760, %v4726_v17 }
 0x1ab   : > { %v748_v36 = vrot.slane %v747_v26, 4  ;;  %v743_v55 = vrot.slane %v742_v49, 1  ;;  %v4748_v27 = vsub.f32 %v1231_v19, %v4739_v23 }
 0x1ac   : > { %v755_v28 = vsel %vm735_vm5, %v732_v33, 0.0  ;;  %v1364_v25 = vsub.f32 %v4726_v17, %v1363_v21 }
 0x1ad   : > { %v749_v40 = vadd.f32 %v748_v36, %v747_v26  ;;  %v756_v34 = vadd.f32 %v755_v28, %v754_v38  ;;  %v726_v41 = vpop.permute.xlu1 %725  ;;  %v744_v60 = vadd.f32 %v743_v55, %v742_v49  ;;  %v1377_v33 = vand.u32 4294901760, %v4748_v27  ;;  %v524_v38 = vld [vmem:[%s5265_s2] sm:$0xf] }
 0x1ae   : > { %v734_v42 = vmul.f32 %v726_v41, %v515_v37  ;;  %v1365_v30 = vand.u32 4294901760, %v1364_v25  ;;  %1238 = vperm.xlu0 %4112, %v524_v38  }
 0x1af   : > { %v750_v43 = vrot.slane %v749_v40, 2  ;;  %v757_v32 = vrot.slane %v756_v34, 4  ;;  %v1378_v36 = vsub.f32 %v4748_v27, %v1377_v33 }
 0x1b0   : > { %v764_v45 = vsel %vm735_vm5, %v734_v42, 0.0 }
 0x1b1   : > { %v751_v46 = vadd.f32 %v750_v43, %v749_v40  ;;  %v758_v47 = vadd.f32 %v757_v32, %v756_v34  ;;  %v765_v48 = vadd.f32 %v764_v45, %v763_v44  ;;  %v1379_v37 = vand.u32 4294901760, %v1378_v36 }
 0x1b3   : > { %v759_v50 = vrot.slane %v758_v47, 2  ;;  %v766_v51 = vrot.slane %v765_v48, 4  ;;  %v752_v52 = vrot.slane %v751_v46, 1 }
 0x1b5   : > { %v760_v53 = vadd.f32 %v759_v50, %v758_v47  ;;  %v767_v54 = vadd.f32 %v766_v51, %v765_v48  ;;  %v753_v58 = vadd.f32 %v752_v52, %v751_v46 }
 0x1b7   : > { %v761_v56 = vrot.slane %v760_v53, 1  ;;  %v768_v57 = vrot.slane %v767_v54, 2  ;;  %v778_v3 = vsel %vm777_vm6, %v753_v58, %v744_v60  ;;  %v1753_v60 = vld [vmem:[#allocation8 + $0x10] sm:$0xff] }
 0x1b9   : > { %v769_v6 = vadd.f32 %v768_v57, %v767_v54  ;;  %v762_v59 = vadd.f32 %v761_v56, %v760_v53 }
 0x1bb   : > { %v770_v1 = vrot.slane %v769_v6, 1  ;;  %v780_v4 = vsel %vm779_vm7, %v762_v59, %v778_v3  ;;  %v1752_v3 = vld [vmem:[#allocation8 + $0x8] sm:$0xff] }
 0x1bd   : > { %v771_v2 = vadd.f32 %v770_v1, %v769_v6  ;;  %v1754_v6 = vld [vmem:[#allocation8 + $0x18] sm:$0xff] }
 0x1be   : > { %v4815_v59 = vand.u32 4294901760, %v1754_v6 }
 0x1bf   : > { %v782_v5 = vsel %vm781_vm8, %v771_v2, %v780_v4  ;;  %v4820_v2 = vand.u32 4294901760, %v1753_v60 }
 0x1c0   : > { %v783_v7 = vsel %vm735_vm5, %v782_v5, 0  ;;  %v4818_v1 = vsub.f32 %v1754_v6, %v4815_v59 }
 0x1c1   : > { %v851_v8 = vand.u32 4294901760, %v783_v7  ;;  %v4826_v5 = vsub.f32 %v1753_v60, %v4820_v2 }
 0x1c2   : > { %v1870_v4 = vand.u32 4294901760, %v4818_v1 }
 0x1c3   : > { %v852_v9 = vsub.f32 %v783_v7, %v851_v8  ;;  %3683 = vmatmul.mubr.f32.vlgmr.msra.gmra.mxu1 %v851_v8  ;;  %v4828_v7 = vand.u32 4294901760, %v1752_v3 }
 0x1c4   : > { %3691 = vmatpush3.msra.mxu1 %v4643_v61  ;;  %3692 = vmatprep.mubr.msk.f32.mxu1 %vm4350_vm4, %v4349_v0 }
 0x1c5   : > { %v853_v10 = vand.u32 4294901760, %v852_v9  ;;  %3700 = vmatprep.subr.mxu1 %v4349_v0 }
 0x1c7   : > { %3693 = vmatmul.mubr.f32.vlgmr.msra.gmra.mxu1 %v853_v10  ;;  %v854_v11 = vsub.f32 %v852_v9, %v853_v10  ;;  %v1877_v10 = vand.u32 4294901760, %v4826_v5 }
 0x1c8   : > { %3701 = vmatpush3.msra.mxu1 %v4643_v61  ;;  %3702 = vmatprep.mubr.msk.f32.mxu1 %vm4350_vm4, %v4349_v0  ;;  %v1234_v61 = vld [vmem:[#allocation6 + $0x18] sm:$0xff] }
 0x1c9   : > { %v855_v12 = vand.u32 4294901760, %v854_v11  ;;  %3716 = vmatprep.subr.mxu1 %v4349_v0  ;;  %v4715_v13 = vand.u32 4294901760, %v1234_v61  ;;  %v4837_v11 = vsub.f32 %v1752_v3, %v4828_v7  ;;  %v2260_v3 = vld [vmem:[#allocation9 + $0x20] sm:$0xff] }
 0x1cb   : > { %3678 = vmatmul.mubr.f32.vlgmr.msra.gmra.mxu0 %v855_v12  ;;  %3703 = vmatmul.mubr.f32.vlgmr.msra.gmra.mxu1 %v851_v8  ;;  %v4718_v15 = vsub.f32 %v1234_v61, %v4715_v13  ;;  %v1884_v14 = vand.u32 4294901760, %v4837_v11 }
 0x1cc   : > { %3686 = vmatpush3.msra.mxu0 %v4646_v62  ;;  %3687 = vmatprep.mubr.msk.f32.mxu0 %vm4350_vm4, %v4349_v0  ;;  %v1232_v62 = vld [vmem:[#allocation6 + $0x8] sm:$0xff] }
 0x1cd   : > { %3695 = vmatprep.subr.mxu0 %v4349_v0  ;;  %3724 = vmatprep.mubr.msk.f32.mxu1 %vm4350_vm4, %v4349_v0  ;;  %v4728_v18 = vand.u32 4294901760, %v1232_v62 }
 0x1cf   : > { %3688 = vmatmul.mubr.f32.vlgmr.msra.gmra.mxu0 %v852_v9  ;;  %v4737_v22 = vsub.f32 %v1232_v62, %v4728_v18  ;;  %v1871_v9 = vsub.f32 %v4818_v1, %v1870_v4  ;;  %v1885_v62 = vsub.f32 %v4837_v11, %v1884_v14 }
 0x1d0   : > { %3696 = vmatpush3.msra.mxu0 %v894_v63  ;;  %3697 = vmatprep.mubr.msk.f32.mxu0 %vm4350_vm4, %v4349_v0  ;;  %v1356_v63 = vand.u32 4294901760, %v4718_v15 }
 0x1d1   : > { %3705 = vmatprep.subr.mxu0 %v4349_v0  ;;  %v1370_v26 = vand.u32 4294901760, %v4737_v22  ;;  %v1872_v61 = vand.u32 4294901760, %v1871_v9  ;;  %v2259_v9 = vld [vmem:[#allocation9 + $0x18] sm:$0xff] }
 0x1d2   : > { %v1357_v20 = vsub.f32 %v4718_v15, %v1356_v63 }
 0x1d3   : > { %3698 = vmatmul.mubr.f32.vlgmr.msra.gmra.mxu0 %v851_v8  ;;  %v1371_v31 = vsub.f32 %v4737_v22, %v1370_v26  ;;  %v1751_v8 = vld [vmem:[#allocation8] sm:$0xff] }
 0x1d4   : > { %3713 = vmatprep.mubr.msk.f32.mxu0 %vm4350_vm4, %v4349_v0  ;;  %3706 = vmatpush3.msra.mxu0 %v4715_v13  ;;  %v1358_v24 = vand.u32 4294901760, %v1357_v20  ;;  %v4839_v12 = vand.u32 4294901760, %v1751_v8 }
 0x1d5   : > { %3707 = vmatprep.subr.mxu0 %v4349_v0  ;;  %v1372_v35 = vand.u32 4294901760, %v1371_v31 }
 0x1d6   : > { %3708 = vmatpush3.msra.mxu0 %v4720_v16  ;;  %3717 = vmatpush3.msra.mxu1 %v1358_v24 }
 0x1d7   : > { %3709 = vmatprep.subr.mxu0 %v4349_v0  ;;  %3718 = vmatprep.subr.mxu1 %v4349_v0 }
 0x1d8   : > { %3710 = vmatpush3.msra.mxu0 %v4728_v18  ;;  %3719 = vmatpush3.msra.mxu1 %v1365_v30 }
 0x1d9   : > { %3711 = vmatprep.subr.mxu0 %v4349_v0  ;;  %3720 = vmatprep.subr.mxu1 %v4349_v0 }
 0x1da   : > { %3712 = vmatpush3.msra.mxu0 %v4739_v23  ;;  %3721 = vmatpush3.msra.mxu1 %v1372_v35 }
 0x1db   : > { %3727 = vmatprep.subr.mxu0 %v4349_v0  ;;  %3722 = vmatprep.subr.mxu1 %v4349_v0 }
 0x1dc   : > { %3723 = vmatpush3.msra.mxu1 %v1379_v37 }
 0x1dd   : > { %3738 = vmatprep.subr.mxu1 %v4349_v0 }
 0x283   : > { %v933_v28 = vpop.f32.mrf.mxu1 }
 0x285   : > { %v3684_v40 = vpop.f32.mrf.mxu1 }
 0x287   : > { %v1081_v34 = vpop.f32.mrf.mxu1 }
 0x289   : > { %v3694_v41 = vpop.f32.mrf.mxu1 }
 0x28a   : > { %v3506_v41 = vld [vmem:[%s5270_s7] ss:$0 sm:$0xff] }
 0x28b   : > { %v857_v42 = vpop.f32.mrf.mxu0  ;;  %v1227_v29 = vpop.f32.mrf.mxu1 }
 0x28c   : > { %v934_v44 = vadd.f32 %v933_v28, %v857_v42 }
 0x28d   : > { %v3679_v43 = vpop.f32.mrf.mxu0  ;;  %v3704_v32 = vpop.f32.mrf.mxu1 }
 0x28f   : > { %v1007_v45 = vpop.f32.mrf.mxu0 }
 0x290   : > { %v1008_v46 = vadd.f32 %v1007_v45, %v934_v44 }
 0x291   : > { %v3689_v47 = vpop.f32.mrf.mxu0 }
 0x292   : > { %v1082_v48 = vadd.f32 %v1081_v34, %v1008_v46 }
 0x293   : > { %v1155_v49 = vpop.f32.mrf.mxu0 }
 0x294   : > { %v1156_v50 = vadd.f32 %v1155_v49, %v1082_v48 }
 0x295   : > { %v3699_v51 = vpop.f32.mrf.mxu0 }
 0x296   : > { %v1228_v52 = vadd.f32 %v1227_v29, %v1156_v50 }
 0x298   : > { %v1248_v53 = vsel %vm1246_vm9, %v1228_v52, 0 }
 0x299   : > { %v1319_v54 = vand.u32 4294901760, %v1248_v53 }
 0x29b   : > { %v1320_v55 = vsub.f32 %v1248_v53, %v1319_v54  ;;  %3725 = vmatmul.mubr.f32.vlgmr.msra.gmra.mxu1 %v1319_v54 }
 0x29c   : > { %3739 = vmatpush3.msra.mxu1 %v4715_v13  ;;  %3746 = vmatprep.mubr.msk.f32.mxu1 %vm4350_vm4, %v4349_v0 }
 0x29d   : > { %3740 = vmatprep.subr.mxu1 %v4349_v0  ;;  %v1321_v56 = vand.u32 4294901760, %v1320_v55 }
 0x29e   : > { %3741 = vmatpush3.msra.mxu1 %v4720_v16 }
 0x29f   : > { %3742 = vmatprep.subr.mxu1 %v4349_v0  ;;  %v1322_v57 = vsub.f32 %v1320_v55, %v1321_v56 }
 0x2a0   : > { %3743 = vmatpush3.msra.mxu1 %v4728_v18 }
 0x2a1   : > { %3744 = vmatprep.subr.mxu1 %v4349_v0  ;;  %v1323_v58 = vand.u32 4294901760, %v1322_v57  ;;  %v2262_v57 = vld [vmem:[#allocation9 + $0x30] sm:$0xff] }
 0x2a2   : > { %3745 = vmatpush3.msra.mxu1 %v4739_v23  ;;  %v4927_v6 = vand.u32 4294901760, %v2262_v57 }
 0x2a3   : > { %3747 = vmatmul.mubr.f32.vlgmr.msra.gmra.mxu1 %v1321_v56  ;;  %3760 = vmatprep.subr.mxu1 %v4349_v0 }
 0x2a4   : > { %3714 = vmatmul.mubr.f32.vlgmr.msra.gmra.mxu0 %v1323_v58  ;;  %3761 = vmatpush3.msra.mxu1 %v4715_v13  ;;  %v1878_v13 = vsub.f32 %v4826_v5, %v1877_v10 }
 0x2a5   : > { %3728 = vmatpush3.msra.mxu0 %v4718_v15  ;;  %3762 = vmatprep.subr.mxu1 %v4349_v0  ;;  %v4848_v15 = vsub.f32 %v1751_v8, %v4839_v12  ;;  %v4946_v8 = vand.u32 4294901760, %v2260_v3 }
 0x2a6   : > { %3729 = vmatprep.subr.mxu0 %v4349_v0  ;;  %3763 = vmatpush3.msra.mxu1 %v4720_v16  ;;  %v1879_v16 = vand.u32 4294901760, %v1878_v13  ;;  %v4958_v13 = vand.u32 4294901760, %v2259_v9 }
 0x2a7   : > { %3730 = vmatpush3.msra.mxu0 %v4726_v17  ;;  %3764 = vmatprep.subr.mxu1 %v4349_v0  ;;  %v1886_v17 = vand.u32 4294901760, %v1885_v62 }
 0x2a8   : > { %3731 = vmatprep.subr.mxu0 %v4349_v0  ;;  %3765 = vmatpush3.msra.mxu1 %v4728_v18 }
 0x2a9   : > { %3732 = vmatpush3.msra.mxu0 %v4737_v22  ;;  %3766 = vmatprep.subr.mxu1 %v4349_v0  ;;  %v3505_v22 = vld [vmem:[%s5270_s7 + $0x1] ss:$0 sm:$0xff] }
 0x2aa   : > { %3733 = vmatprep.subr.mxu0 %v4349_v0  ;;  %3735 = vmatprep.mubr.msk.f32.mxu0 %vm4350_vm4, %v4349_v0 }
 0x2ab   : > { %3734 = vmatpush3.msra.mxu0 %v4748_v27  ;;  %3767 = vmatpush3.msra.mxu1 %v4739_v23  ;;  %v4866_v23 = vpop.permute.xlu0 %1238 }
 0x2ac   : > { %3768 = vmatprep.mubr.msk.f32.mxu1 %vm4350_vm4, %v4349_v0  ;;  %3736 = vmatmul.mubr.f32.vlgmr.msra.gmra.mxu0 %v1320_v55  ;;  %v1245_v27 = vmul.f32 %v3505_v22, %v4866_v23  ;;  %v2263_v55 = vld [vmem:[#allocation9 + $0x38] sm:$0xff] }
 0x2ad   : > { %3749 = vmatprep.subr.mxu0 %v4349_v0  ;;  %3769 = vmatmul.mubr.f32.vlgmr.msra.gmra.mxu1 %v1319_v54  ;;  %v4922_v56 = vand.u32 4294901760, %v2263_v55 }
 0x2ae   : > { %3750 = vmatpush3.msra.mxu0 %v1356_v63  ;;  %3757 = vmatprep.mubr.msk.f32.mxu0 %vm4350_vm4, %v4349_v0  ;;  %v1891_v63 = vand.u32 4294901760, %v4848_v15 }
 0x2af   : > { %3751 = vmatprep.subr.mxu0 %v4349_v0  ;;  %3782 = vmatprep.subr.mxu1 %v4349_v0  ;;  %v4925_v58 = vsub.f32 %v2263_v55, %v4922_v56 }
 0x2b0   : > { %3752 = vmatpush3.msra.mxu0 %v1363_v21  ;;  %3790 = vmatprep.mubr.msk.f32.mxu1 %vm4350_vm4, %v4349_v0  ;;  %v1892_v18 = vsub.f32 %v4848_v15, %v1891_v63 }
 0x2b1   : > { %3753 = vmatprep.subr.mxu0 %v4349_v0  ;;  %3783 = vmatpush3.msra.mxu1 %v1872_v61  ;;  %v2375_v60 = vand.u32 4294901760, %v4925_v58  ;;  %v4955_v61 = vsub.f32 %v2260_v3, %v4946_v8 }
 0x2b2   : > { %3754 = vmatpush3.msra.mxu0 %v1370_v26  ;;  %3784 = vmatprep.subr.mxu1 %v4349_v0  ;;  %v1893_v19 = vand.u32 4294901760, %v1892_v18  ;;  %v2257_v18 = vld [vmem:[#allocation9 + $0x8] sm:$0xff] }
 0x2b3   : > { %3755 = vmatprep.subr.mxu0 %v4349_v0  ;;  %3785 = vmatpush3.msra.mxu1 %v1879_v16  ;;  %v2396_v62 = vand.u32 4294901760, %v4955_v61  ;;  %v4978_v22 = vand.u32 4294901760, %v2257_v18 }
 0x2b4   : > { %3756 = vmatpush3.msra.mxu0 %v1377_v33  ;;  %3786 = vmatprep.subr.mxu1 %v4349_v0 }
 0x2b5   : > { %3758 = vmatmul.mubr.f32.vlgmr.msra.gmra.mxu0 %v1319_v54  ;;  %3771 = vmatprep.subr.mxu0 %v4349_v0 }
 0x2b6   : > { %3779 = vmatprep.mubr.msk.f32.mxu0 %vm4350_vm4, %v4349_v0  ;;  %3772 = vmatpush3.msra.mxu0 %v4815_v59 }
 0x2b7   : > { %3773 = vmatprep.subr.mxu0 %v4349_v0  ;;  %3787 = vmatpush3.msra.mxu1 %v1886_v17  ;;  %v4969_v17 = vsub.f32 %v2259_v9, %v4958_v13 }
 0x2b8   : > { %3774 = vmatpush3.msra.mxu0 %v4820_v2  ;;  %3788 = vmatprep.subr.mxu1 %v4349_v0 }
 0x2b9   : > { %3775 = vmatprep.subr.mxu0 %v4349_v0  ;;  %3789 = vmatpush3.msra.mxu1 %v1893_v19 }
 0x2ba   : > { %3776 = vmatpush3.msra.mxu0 %v4828_v7  ;;  %3804 = vmatprep.subr.mxu1 %v4349_v0 }
 0x2bb   : > { %3777 = vmatprep.subr.mxu0 %v4349_v0 }
 0x2bc   : > { %3778 = vmatpush3.msra.mxu0 %v4839_v12 }
 0x2bd   : > { %3793 = vmatprep.subr.mxu0 %v4349_v0 }
 0x35b   : > { %v1416_v20 = vpop.f32.mrf.mxu1 }
 0x35d   : > { %v3726_v21 = vpop.f32.mrf.mxu1 }
 0x363   : > { %v1573_v24 = vpop.f32.mrf.mxu1 }
 0x364   : > { %v1325_v25 = vpop.f32.mrf.mxu0 }
 0x365   : > { %v3748_v26 = vpop.f32.mrf.mxu1  ;;  %v1326_v31 = vadd.f32 %v1325_v25, %v1245_v27  ;;  %v2256_v25 = vld [vmem:[#allocation9] sm:$0xff] }
 0x366   : > { %v3715_v30 = vpop.f32.mrf.mxu0 }
 0x367   : > { %v1417_v36 = vadd.f32 %v1416_v20, %v1326_v31  ;;  %v2397_v20 = vsub.f32 %v4955_v61, %v2396_v62  ;;  %v4986_v30 = vsub.f32 %v2257_v18, %v4978_v22  ;;  %v4988_v31 = vand.u32 4294901760, %v2256_v25 }
 0x369   : > { %v2398_v26 = vand.u32 4294901760, %v2397_v20 }
 0x36c   : > { %v1496_v33 = vpop.f32.mrf.mxu0 }
 0x36d   : > { %v1731_v35 = vpop.f32.mrf.mxu1  ;;  %v1497_v39 = vadd.f32 %v1496_v33, %v1417_v36  ;;  %v2417_v36 = vand.u32 4294901760, %v4986_v30 }
 0x36e   : > { %v3737_v37 = vpop.f32.mrf.mxu0 }
 0x36f   : > { %v3770_v38 = vpop.f32.mrf.mxu1  ;;  %v1574_v28 = vadd.f32 %v1573_v24, %v1497_v39  ;;  %v2403_v24 = vand.u32 4294901760, %v4969_v17  ;;  %v5001_v37 = vsub.f32 %v2256_v25, %v4988_v31 }
 0x371   : > { %v2404_v33 = vsub.f32 %v4969_v17, %v2403_v24 }
 0x373   : > { %v2405_v38 = vand.u32 4294901760, %v2404_v33 }
 0x375   : > { %v1656_v40 = vpop.f32.mrf.mxu0 }
 0x376   : > { %v1657_v34 = vadd.f32 %v1656_v40, %v1574_v28  ;;  %v2418_v28 = vsub.f32 %v4986_v30, %v2417_v36  ;;  %v2424_v40 = vand.u32 4294901760, %v5001_v37 }
 0x377   : > { %v3759_v42 = vpop.f32.mrf.mxu0 }
 0x378   : > { %v1732_v29 = vadd.f32 %v1731_v35, %v1657_v34  ;;  %v2419_v34 = vand.u32 4294901760, %v2418_v28 }
 0x37a   : > { %v1740_v43 = vadd.f32 %v3506_v41, %v1732_v29  ;;  %v2425_v41 = vsub.f32 %v5001_v37, %v2424_v40 }
 0x37c   : > { %v1741_v32 = vmax.f32 %v1740_v43, 0.0  ;;  %v2426_v42 = vand.u32 4294901760, %v2425_v41 }
 0x37e   : > { %v3507_v44 = vmul.f32 -1.442695, %v1741_v32  ;;  %v1762_v45 = vsel %vm1246_vm9, %v1741_v32, 0 }
 0x37f   : > { %v1833_v46 = vand.u32 4294901760, %v1762_v45 }
 0x380   : > { %4129 = vpow2.f32 %v3507_v44 }
 0x381   : > { %v1834_v47 = vsub.f32 %v1762_v45, %v1833_v46  ;;  %3791 = vmatmul.mubr.f32.vlgmr.msra.gmra.mxu1 %v1833_v46  ;;  %v3508_v45 = vld [vmem:[%s5270_s7 + $0x3] ss:$0 sm:$0xff] }
 0x382   : > { %3805 = vmatpush3.msra.mxu1 %v4815_v59  ;;  %3812 = vmatprep.mubr.msk.f32.mxu1 %vm4350_vm4, %v4349_v0 }
 0x383   : > { %3806 = vmatprep.subr.mxu1 %v4349_v0  ;;  %v1835_v48 = vand.u32 4294901760, %v1834_v47 }
 0x384   : > { %3807 = vmatpush3.msra.mxu1 %v4820_v2 }
 0x385   : > { %3808 = vmatprep.subr.mxu1 %v4349_v0  ;;  %v1836_v49 = vsub.f32 %v1834_v47, %v1835_v48 }
 0x386   : > { %3809 = vmatpush3.msra.mxu1 %v4828_v7 }
 0x387   : > { %3810 = vmatprep.subr.mxu1 %v4349_v0  ;;  %v1837_v50 = vand.u32 4294901760, %v1836_v49 }
 0x388   : > { %3811 = vmatpush3.msra.mxu1 %v4839_v12 }
 0x389   : > { %3813 = vmatmul.mubr.f32.vlgmr.msra.gmra.mxu1 %v1835_v48  ;;  %3826 = vmatprep.subr.mxu1 %v4349_v0  ;;  %v1760_v48 = vmul.f32 %v3508_v45, %v4866_v23 }
 0x38a   : > { %3780 = vmatmul.mubr.f32.vlgmr.msra.gmra.mxu0 %v1837_v50  ;;  %3827 = vmatpush3.msra.mxu1 %v4815_v59  ;;  %v2261_v59 = vld [vmem:[#allocation9 + $0x28] sm:$0xff] }
 0x38b   : > { %3794 = vmatpush3.msra.mxu0 %v4818_v1  ;;  %3828 = vmatprep.subr.mxu1 %v4349_v0  ;;  %v4933_v1 = vsub.f32 %v2262_v57, %v4927_v6 }
 0x38c   : > { %3795 = vmatprep.subr.mxu0 %v4349_v0  ;;  %3829 = vmatpush3.msra.mxu1 %v4820_v2  ;;  %v4935_v2 = vand.u32 4294901760, %v2261_v59 }
 0x38d   : > { %v4130_v51 = vpop.eup %4129  ;;  %3796 = vmatpush3.msra.mxu0 %v4826_v5  ;;  %3830 = vmatprep.subr.mxu1 %v4349_v0  ;;  %v2382_v5 = vand.u32 4294901760, %v4933_v1 }
 0x38e   : > { %v1745_v52 = vadd.f32 1.0, %v4130_v51  ;;  %3797 = vmatprep.subr.mxu0 %v4349_v0  ;;  %3831 = vmatpush3.msra.mxu1 %v4828_v7  ;;  %v4944_v7 = vsub.f32 %v2261_v59, %v4935_v2 }
 0x38f   : > { %3798 = vmatpush3.msra.mxu0 %v4837_v11  ;;  %3832 = vmatprep.subr.mxu1 %v4349_v0  ;;  %v2383_v11 = vsub.f32 %v4933_v1, %v2382_v5 }
 0x390   : > { %4131 = vrcp.f32 %v1745_v52  ;;  %3799 = vmatprep.subr.mxu0 %v4349_v0  ;;  %3801 = vmatprep.mubr.msk.f32.mxu0 %vm4350_vm4, %v4349_v0 }
 0x391   : > { %3800 = vmatpush3.msra.mxu0 %v4848_v15  ;;  %3833 = vmatpush3.msra.mxu1 %v4839_v12  ;;  %v2389_v12 = vand.u32 4294901760, %v4944_v7  ;;  %v2384_v15 = vand.u32 4294901760, %v2383_v11 }
 0x392   : > { %3834 = vmatprep.mubr.msk.f32.mxu1 %vm4350_vm4, %v4349_v0  ;;  %3802 = vmatmul.mubr.f32.vlgmr.msra.gmra.mxu0 %v1834_v47 }
 0x393   : > { %3815 = vmatprep.subr.mxu0 %v4349_v0  ;;  %3835 = vmatmul.mubr.f32.vlgmr.msra.gmra.mxu1 %v1833_v46  ;;  %v2390_v16 = vsub.f32 %v4944_v7, %v2389_v12 }
 0x394   : > { %3816 = vmatpush3.msra.mxu0 %v1870_v4  ;;  %3823 = vmatprep.mubr.msk.f32.mxu0 %vm4350_vm4, %v4349_v0  ;;  %v2376_v4 = vsub.f32 %v4925_v58, %v2375_v60 }
 0x395   : > { %3817 = vmatprep.subr.mxu0 %v4349_v0  ;;  %3856 = vmatprep.subr.mxu1 %v4349_v0  ;;  %v2391_v19 = vand.u32 4294901760, %v2390_v16 }
 0x396   : > { %3818 = vmatpush3.msra.mxu0 %v1877_v10  ;;  %3872 = vmatprep.mubr.msk.f32.mxu1 %vm4350_vm4, %v4349_v0  ;;  %v2377_v10 = vand.u32 4294901760, %v2376_v4  ;;  %v3509_v4 = vld [vmem:[%s5270_s7 + $0x2] ss:$0 sm:$0xff] }
 0x397   : > { %3819 = vmatprep.subr.mxu0 %v4349_v0 }
 0x398   : > { %3820 = vmatpush3.msra.mxu0 %v1884_v14  ;;  %v2258_v14 = vld [vmem:[#allocation9 + $0x10] sm:$0xff]  ;;  %3857 = vmatpush3.msra.mxu1 %v2377_v10 }
 0x399   : > { %3821 = vmatprep.subr.mxu0 %v4349_v0  ;;  %3858 = vmatprep.subr.mxu1 %v4349_v0 }
 0x39a   : > { %3822 = vmatpush3.msra.mxu0 %v1891_v63  ;;  %v4965_v63 = vand.u32 4294901760, %v2258_v14  ;;  %3859 = vmatpush3.msra.mxu1 %v2384_v15 }
 0x39b   : > { %3824 = vmatmul.mubr.f32.vlgmr.msra.gmra.mxu0 %v1833_v46  ;;  %3837 = vmatprep.subr.mxu0 %v4349_v0 }
 0x39c   : > { %3853 = vmatprep.mubr.msk.f32.mxu0 %vm4350_vm4, %v4349_v0  ;;  %3838 = vmatpush3.msra.mxu0 %v4922_v56  ;;  %v4976_v21 = vsub.f32 %v2258_v14, %v4965_v63 }
 0x39d   : > { %v4132_v53 = vpop.eup %4131  ;;  %3839 = vmatprep.subr.mxu0 %v4349_v0  ;;  %3860 = vmatprep.subr.mxu1 %v4349_v0 }
 0x39e   : > { %v1748_v54 = vsel %vm1246_vm9, %v1741_v32, %v4132_v53  ;;  %3840 = vmatpush3.msra.mxu0 %v4927_v6  ;;  %3861 = vmatpush3.msra.mxu1 %v2391_v19  ;;  %v2410_v27 = vand.u32 4294901760, %v4976_v21 }
 0x39f   : > { %1750 = vst.msk [vmem:[#allocation12] sm:$0xf] %vm1749_vm10, %v1748_v54  ;;  %3841 = vmatprep.subr.mxu0 %v4349_v0  ;;  %3862 = vmatprep.subr.mxu1 %v4349_v0 }
 0x3a0   : > { %3842 = vmatpush3.msra.mxu0 %v4935_v2  ;;  %3863 = vmatpush3.msra.mxu1 %v2398_v26  ;;  %v2411_v35 = vsub.f32 %v4976_v21, %v2410_v27 }
 0x3a1   : > { %3843 = vmatprep.subr.mxu0 %v4349_v0  ;;  %3864 = vmatprep.subr.mxu1 %v4349_v0 }
 0x3a2   : > { %3844 = vmatpush3.msra.mxu0 %v4946_v8  ;;  %v2412_v39 = vand.u32 4294901760, %v2411_v35  ;;  %3865 = vmatpush3.msra.mxu1 %v2405_v38 }
 0x3a3   : > { %3845 = vmatprep.subr.mxu0 %v4349_v0  ;;  %3866 = vmatprep.subr.mxu1 %v4349_v0 }
 0x3a4   : > { %3846 = vmatpush3.msra.mxu0 %v4958_v13  ;;  %3867 = vmatpush3.msra.mxu1 %v2412_v39 }
 0x3a5   : > { %3847 = vmatprep.subr.mxu0 %v4349_v0  ;;  %3868 = vmatprep.subr.mxu1 %v4349_v0 }
 0x3a6   : > { %3848 = vmatpush3.msra.mxu0 %v4965_v63  ;;  %3869 = vmatpush3.msra.mxu1 %v2419_v34 }
 0x3a7   : > { %3849 = vmatprep.subr.mxu0 %v4349_v0  ;;  %3870 = vmatprep.subr.mxu1 %v4349_v0 }
 0x3a8   : > { %3850 = vmatpush3.msra.mxu0 %v4978_v22  ;;  %3871 = vmatpush3.msra.mxu1 %v2426_v42 }
 0x3a9   : > { %3851 = vmatprep.subr.mxu0 %v4349_v0  ;;  %3894 = vmatprep.subr.mxu1 %v4349_v0 }
 0x3aa   : > { %3852 = vmatpush3.msra.mxu0 %v4988_v31 }
 0x3ab   : > { %3875 = vmatprep.subr.mxu0 %v4349_v0 }
 0x441   : > { %v1930_v29 = vpop.f32.mrf.mxu1 }
 0x443   : > { %v3792_v43 = vpop.f32.mrf.mxu1 }
 0x449   : > { %v2087_v32 = vpop.f32.mrf.mxu1 }
 0x44a   : > { %v1839_v44 = vpop.f32.mrf.mxu0 }
 0x44b   : > { %v3814_v46 = vpop.f32.mrf.mxu1  ;;  %v1840_v49 = vadd.f32 %v1839_v44, %v1760_v48 }
 0x44c   : > { %v3781_v47 = vpop.f32.mrf.mxu0 }
 0x44d   : > { %v1931_v52 = vadd.f32 %v1930_v29, %v1840_v49 }
 0x452   : > { %v2010_v50 = vpop.f32.mrf.mxu0 }
 0x453   : > { %v2245_v51 = vpop.f32.mrf.mxu1  ;;  %v2011_v55 = vadd.f32 %v2010_v50, %v1931_v52 }
 0x454   : > { %v3803_v53 = vpop.f32.mrf.mxu0 }
 0x455   : > { %v3836_v54 = vpop.f32.mrf.mxu1  ;;  %v2088_v57 = vadd.f32 %v2087_v32, %v2011_v55 }
 0x45b   : > { %v2170_v59 = vpop.f32.mrf.mxu0 }
 0x45c   : > { %v2171_v3 = vadd.f32 %v2170_v59, %v2088_v57 }
 0x45d   : > { %v3825_v9 = vpop.f32.mrf.mxu0 }
 0x45e   : > { %v2246_v10 = vadd.f32 %v2245_v51, %v2171_v3 }
 0x460   : > { %v2254_v11 = vadd.f32 %v3509_v4, %v2246_v10 }
 0x462   : > { %v2255_v14 = vmax.f32 %v2254_v11, 0.0 }
 0x464   : > { %v2271_v23 = vsel %vm2269_vm11, %v2255_v14, 0 }
 0x465   : > { %v5025_v15 = vand.u32 4294901760, %v2271_v23 }
 0x467   : > { %3873 = vmatmul.mubr.f32.vlgmr.msra.gmra.mxu1 %v5025_v15  ;;  %v2347_v16 = vsub.f32 %v2271_v23, %v5025_v15 }
 0x468   : > { %3895 = vmatpush3.msra.mxu1 %v4922_v56  ;;  %3910 = vmatprep.mubr.msk.f32.mxu1 %vm4350_vm4, %v4349_v0 }
 0x469   : > { %3896 = vmatprep.subr.mxu1 %v4349_v0  ;;  %v2348_v18 = vand.u32 4294901760, %v2347_v16 }
 0x46a   : > { %3897 = vmatpush3.msra.mxu1 %v4927_v6 }
 0x46b   : > { %3898 = vmatprep.subr.mxu1 %v4349_v0  ;;  %v2349_v19 = vsub.f32 %v2347_v16, %v2348_v18 }
 0x46c   : > { %3899 = vmatpush3.msra.mxu1 %v4935_v2 }
 0x46d   : > { %3900 = vmatprep.subr.mxu1 %v4349_v0  ;;  %v2350_v20 = vand.u32 4294901760, %v2349_v19 }
 0x46e   : > { %3901 = vmatpush3.msra.mxu1 %v4946_v8 }
 0x46f   : > { %3902 = vmatprep.subr.mxu1 %v4349_v0  ;;  %3854 = vmatmul.mubr.f32.vlgmr.msra.gmra.mxu0 %v2350_v20 }
 0x470   : > { %3876 = vmatpush3.msra.mxu0 %v4925_v58  ;;  %3903 = vmatpush3.msra.mxu1 %v4958_v13 }
 0x471   : > { %3877 = vmatprep.subr.mxu0 %v4349_v0  ;;  %3904 = vmatprep.subr.mxu1 %v4349_v0 }
 0x472   : > { %3878 = vmatpush3.msra.mxu0 %v4933_v1  ;;  %3905 = vmatpush3.msra.mxu1 %v4965_v63 }
 0x473   : > { %3879 = vmatprep.subr.mxu0 %v4349_v0  ;;  %3906 = vmatprep.subr.mxu1 %v4349_v0 }
 0x474   : > { %3880 = vmatpush3.msra.mxu0 %v4944_v7  ;;  %3907 = vmatpush3.msra.mxu1 %v4978_v22 }
 0x475   : > { %3881 = vmatprep.subr.mxu0 %v4349_v0  ;;  %3908 = vmatprep.subr.mxu1 %v4349_v0 }
 0x476   : > { %3882 = vmatpush3.msra.mxu0 %v4955_v61  ;;  %3909 = vmatpush3.msra.mxu1 %v4988_v31 }
 0x477   : > { %3883 = vmatprep.subr.mxu0 %v4349_v0  ;;  %3911 = vmatmul.mubr.f32.vlgmr.msra.gmra.mxu1 %v2348_v18 }
 0x478   : > { %3932 = vmatprep.subr.mxu1 %v4349_v0  ;;  %3884 = vmatpush3.msra.mxu0 %v4969_v17 }
 0x479   : > { %3933 = vmatpush3.msra.mxu1 %v4922_v56  ;;  %3885 = vmatprep.subr.mxu0 %v4349_v0 }
 0x47a   : > { %3934 = vmatprep.subr.mxu1 %v4349_v0  ;;  %3886 = vmatpush3.msra.mxu0 %v4976_v21 }
 0x47b   : > { %3935 = vmatpush3.msra.mxu1 %v4927_v6  ;;  %3887 = vmatprep.subr.mxu0 %v4349_v0 }
 0x47c   : > { %3936 = vmatprep.subr.mxu1 %v4349_v0  ;;  %3888 = vmatpush3.msra.mxu0 %v4986_v30 }
 0x47d   : > { %3937 = vmatpush3.msra.mxu1 %v4935_v2  ;;  %3889 = vmatprep.subr.mxu0 %v4349_v0 }
 0x47e   : > { %3938 = vmatprep.subr.mxu1 %v4349_v0  ;;  %3890 = vmatpush3.msra.mxu0 %v5001_v37 }
 0x47f   : > { %3891 = vmatprep.mubr.msk.f32.mxu0 %vm4350_vm4, %v4349_v0  ;;  %3939 = vmatpush3.msra.mxu1 %v4946_v8  ;;  %v3510_v8 = vld [vmem:[%s5270_s7 + $0x4] ss:$0 sm:$0xff] }
 0x480   : > { %3892 = vmatmul.mubr.f32.vlgmr.msra.gmra.mxu0 %v2347_v16  ;;  %3913 = vmatprep.subr.mxu0 %v4349_v0 }
 0x481   : > { %3940 = vmatprep.subr.mxu1 %v4349_v0  ;;  %3914 = vmatpush3.msra.mxu0 %v2375_v60 }
 0x482   : > { %3941 = vmatpush3.msra.mxu1 %v4958_v13  ;;  %3915 = vmatprep.subr.mxu0 %v4349_v0 }
 0x483   : > { %3942 = vmatprep.subr.mxu1 %v4349_v0  ;;  %3916 = vmatpush3.msra.mxu0 %v2382_v5 }
 0x484   : > { %3943 = vmatpush3.msra.mxu1 %v4965_v63  ;;  %3917 = vmatprep.subr.mxu0 %v4349_v0 }
 0x485   : > { %3944 = vmatprep.subr.mxu1 %v4349_v0  ;;  %3918 = vmatpush3.msra.mxu0 %v2389_v12 }
 0x486   : > { %3945 = vmatpush3.msra.mxu1 %v4978_v22  ;;  %3919 = vmatprep.subr.mxu0 %v4349_v0 }
 0x487   : > { %3946 = vmatprep.subr.mxu1 %v4349_v0  ;;  %3920 = vmatpush3.msra.mxu0 %v2396_v62 }
 0x488   : > { %3947 = vmatpush3.msra.mxu1 %v4988_v31  ;;  %3948 = vmatprep.mubr.msk.f32.mxu1 %vm4350_vm4, %v4349_v0 }
 0x489   : > { %3921 = vmatprep.subr.mxu0 %v4349_v0  ;;  %3949 = vmatmul.mubr.f32.vlgmr.msra.gmra.mxu1 %v5025_v15 }
 0x48a   : > { %3922 = vmatpush3.msra.mxu0 %v2403_v24  ;;  %3929 = vmatprep.mubr.msk.f32.mxu0 %vm4350_vm4, %v4349_v0 }
 0x48b   : > { %3923 = vmatprep.subr.mxu0 %v4349_v0 }
 0x48c   : > { %3924 = vmatpush3.msra.mxu0 %v2410_v27 }
 0x48d   : > { %3925 = vmatprep.subr.mxu0 %v4349_v0 }
 0x48e   : > { %3926 = vmatpush3.msra.mxu0 %v2417_v36 }
 0x48f   : > { %3927 = vmatprep.subr.mxu0 %v4349_v0 }
 0x490   : > { %3928 = vmatpush3.msra.mxu0 %v2424_v40 }
 0x491   : > { %3930 = vmatmul.mubr.f32.vlgmr.msra.gmra.mxu0 %v5025_v15 }
 0x527   : > { %v2463_v56 = vpop.f32.mrf.mxu1 }
 0x529   : > { %v3874_v58 = vpop.f32.mrf.mxu1 }
 0x52f   : > { %v2352_v6 = vpop.f32.mrf.mxu0 }
 0x530   : > { %v2353_v12 = vadd.f32 %v3510_v8, %v2352_v6 }
 0x531   : > { %v3855_v60 = vpop.f32.mrf.mxu0 }
 0x532   : > { %v2464_v0 = vadd.f32 %v2463_v56, %v2353_v12 }
 0x537   : > { %v2632_v1 = vpop.f32.mrf.mxu1 }
 0x539   : > { %v3912_v2 = vpop.f32.mrf.mxu1 }
 0x540   : > { %v2551_v5 = vpop.f32.mrf.mxu0 }
 0x541   : > { %v2552_v62 = vadd.f32 %v2551_v5, %v2464_v0 }
 0x542   : > { %v3893_v7 = vpop.f32.mrf.mxu0 }
 0x543   : > { %v2633_v63 = vadd.f32 %v2632_v1, %v2552_v62 }
 0x549   : > { %v2806_v61 = vpop.f32.mrf.mxu1 }
 0x54b   : > { %v3950_v13 = vpop.f32.mrf.mxu1 }
 0x551   : > { %v2727_v17 = vpop.f32.mrf.mxu0 }
 0x552   : > { %v2728_v21 = vadd.f32 %v2727_v17, %v2633_v63 }
 0x553   : > { %v3931_v22 = vpop.f32.mrf.mxu0 }
 0x554   : > { %v2807_v24 = vadd.f32 %v2806_v61, %v2728_v21 }
 0x556   : > { %v2810_v25 = vmax.f32 %v2807_v24, 0.0 }
 0x558   : > { %2814 = vrot.lane.b32.xlu1 %v2810_v25, %s4352_s16  ;;  %2812 = vst.msk [vmem:[#allocation2] sm:$0xf] %vm2811_vm12, %v2810_v25 }
 0x5ca   : > { %v2815_v26 = vpop.permute.xlu1 %2814 }
 0x5cb   : > { %2818 = vst.msk [vmem:[#allocation2 + $0x4] sm:$0xf] %vm2811_vm12, %v2815_v26 }
 0x5cc PF: > { %v2830_v27 = vld [vmem:[%s4567_s23 + $0x18] sm:$0xff]  ;;  %v2829_v30 = vld [vmem:[%s4567_s23 + $0x10] sm:$0xff]  ;;  %v2828_v31 = vld [vmem:[%s4567_s23 + $0x8] sm:$0xff]  ;;  %p2819_p3 = scmp.lt.s32.totalorder %s4438_s21, 1  ;;  %v4353_v33 = vmov 0.0   ;;  %vm4354_vm13 = vmmov 0  }
 0x5cd   : > { %3951 = vmatprep.subr.mxu0 %v4353_v33  ;;  %v5117_v35 = vand.u32 4294901760, %v2830_v27  ;;  %3962 = vmatprep.subr.mxu1 %v4353_v33  ;;  %v5120_v36 = vand.u32 4294901760, %v2829_v30  ;;  %v5122_v37 = vand.u32 4294901760, %v2828_v31  ;;  %v2827_v38 = vld [vmem:[%s4567_s23] sm:$0xff]  ;;  %v2820_v41 = vld [vmem:[#allocation2] sm:$0xf] }
 0x5ce   : > { %v5125_v39 = vand.u32 4294901760, %v2827_v38  ;;  %3959 = vmatprep.mubr.msk.f32.mxu0 %vm4354_vm13, %v4353_v33  ;;  %3970 = vmatprep.mubr.msk.f32.mxu1 %vm4354_vm13, %v4353_v33  ;;  %s2823_s25 = scalar_select %p2819_p3, 1, 0  ;;  %vm2838_vm14 = vcmask 261120  }
 0x5cf   : > { %3952 = vmatpush3.msra.mxu0 %v5117_v35  ;;  %v5133_v28 = vsub.f32 %v2830_v27, %v5117_v35  ;;  %v5136_v40 = vsub.f32 %v2829_v30, %v5120_v36  ;;  %v5139_v34 = vsub.f32 %v2828_v31, %v5122_v37  ;;  %s4355_s23 = smov [#allocation12]   ;;  %p5297_p10 = scmp.eq.s32.totalorder %s4438_s21, 2 }
 0x5d0   : > { %3953 = vmatprep.subr.mxu0 %v4353_v33  ;;  %v5143_v29 = vsub.f32 %v2827_v38, %v5125_v39  ;;  %v2824_v43 = vstv %s2823_s25  ;;  %s3347_s13 = sshll.u32 %s4355_s23, 4  ;;  %s3348_s13 = int_to_ptr.vmem [resolvable:$true] %s3347_s13 }
 0x5d1   : > { %v2948_v32 = vand.u32 4294901760, %v5133_v28  ;;  %3954 = vmatpush3.msra.mxu0 %v5120_v36  ;;  %v2955_v44 = vand.u32 4294901760, %v5136_v40  ;;  %v2962_v45 = vand.u32 4294901760, %v5139_v34  ;;  %vm5149_vm15 = vcmp.eq.s32.totalorder %v2824_v43, 1  ;;  %s4241_s14 = scalar_lea.vmem %s3348_s13, 64  ;;  %p4248_p0 = scmp.lt.s32.totalorder %s3348_s13, %s3348_s13 }
 0x5d2   : > { %v2822_v42 = vld [vmem:[#allocation2 + $0x4] sm:$0xf]  ;;  %3955 = vmatprep.subr.mxu0 %v4353_v33  ;;  %v2969_v47 = vand.u32 4294901760, %v5143_v29  ;;  %p4242_p9 = scmp.ne.s32.totalorder %s3348_s13, %s4241_s14  ;;  %p4249_p2 = scmp.lt.s32.totalorder %s4241_s14, %s4241_s14 }
 0x5d3   : > { %v2826_v48 = vsel %vm5149_vm15, %v2820_v41, %v2822_v42  ;;  %v2949_v49 = vsub.f32 %v5133_v28, %v2948_v32  ;;  %v2956_v50 = vsub.f32 %v5136_v40, %v2955_v44  ;;  %3956 = vmatpush3.msra.mxu0 %v5122_v37  ;;  %v2963_v51 = vsub.f32 %v5139_v34, %v2962_v45 }
 0x5d4   : > { %v2840_v52 = vsel %vm2838_vm14, %v2826_v48, 0  ;;  %3957 = vmatprep.subr.mxu0 %v4353_v33  ;;  %v2970_v57 = vsub.f32 %v5143_v29, %v2969_v47  ;;  %p4243_p8 = pnand %p4242_p9, %p5297_p10  ;;  %p4250_p12 = por %p4249_p2, %p4248_p0 }
 0x5d5   : > { %v2911_v53 = vand.u32 4294901760, %v2840_v52  ;;  %v2950_v54 = vand.u32 4294901760, %v2949_v49  ;;  %v2957_v55 = vand.u32 4294901760, %v2956_v50  ;;  %3958 = vmatpush3.msra.mxu0 %v5125_v39  ;;  %v2964_v3 = vand.u32 4294901760, %v2963_v51 }
 0x5d6   : > { %3973 = vmatprep.subr.mxu0 %v4353_v33  ;;  %v2971_v9 = vand.u32 4294901760, %v2970_v57  ;;  %p4244_p5 = pneg %p4243_p8 }
 0x5d7   : > { %v2912_v59 = vsub.f32 %v2840_v52, %v2911_v53  ;;  %3963 = vmatpush3.msra.mxu1 %v2950_v54 }
 0x5d8   : > { %3964 = vmatprep.subr.mxu1 %v4353_v33  ;;  %p4251_p1 = pnand %p4250_p12, %p4244_p5 }
 0x5d9   : > { %v2913_v4 = vand.u32 4294901760, %v2912_v59  ;;  %3965 = vmatpush3.msra.mxu1 %v2957_v55 }
 0x5da   : > { %3966 = vmatprep.subr.mxu1 %v4353_v33 }
 0x5db   : > { %v2914_v10 = vsub.f32 %v2912_v59, %v2913_v4  ;;  %3967 = vmatpush3.msra.mxu1 %v2964_v3 }
 0x5dc   : > { %3968 = vmatprep.subr.mxu1 %v4353_v33 }
 0x5dd   : > { %v2915_v11 = vand.u32 4294901760, %v2914_v10  ;;  %3969 = vmatpush3.msra.mxu1 %v2971_v9 }
 0x5de   : > { %3971 = vmatmul.mubr.f32.vlgmr.msra.gmra.mxu1 %v2911_v53  ;;  %3984 = vmatprep.subr.mxu1 %v4353_v33 }
 0x5df   : > { %3960 = vmatmul.mubr.f32.vlgmr.msra.gmra.mxu0 %v2915_v11  ;;  %3985 = vmatpush3.msra.mxu1 %v5117_v35 }
 0x5e0   : > { %3974 = vmatpush3.msra.mxu0 %v5133_v28  ;;  %3986 = vmatprep.subr.mxu1 %v4353_v33 }
 0x5e1   : > { %3975 = vmatprep.subr.mxu0 %v4353_v33  ;;  %3987 = vmatpush3.msra.mxu1 %v5120_v36 }
 0x5e2   : > { %3976 = vmatpush3.msra.mxu0 %v5136_v40  ;;  %3988 = vmatprep.subr.mxu1 %v4353_v33 }
 0x5e3   : > { %3977 = vmatprep.subr.mxu0 %v4353_v33  ;;  %3989 = vmatpush3.msra.mxu1 %v5122_v37 }
 0x5e4   : > { %3978 = vmatpush3.msra.mxu0 %v5139_v34  ;;  %3981 = vmatprep.mubr.msk.f32.mxu0 %vm4354_vm13, %v4353_v33 }
 0x5e5   : > { %3979 = vmatprep.subr.mxu0 %v4353_v33  ;;  %3990 = vmatprep.subr.mxu1 %v4353_v33 }
 0x5e6   : > { %3980 = vmatpush3.msra.mxu0 %v5143_v29  ;;  %3991 = vmatpush3.msra.mxu1 %v5125_v39 }
 0x5e7   : > { %3982 = vmatmul.mubr.f32.vlgmr.msra.gmra.mxu0 %v2912_v59  ;;  %3992 = vmatprep.mubr.msk.f32.mxu1 %vm4354_vm13, %v4353_v33 }
 0x5e8   : > { %3995 = vmatprep.subr.mxu0 %v4353_v33  ;;  %3993 = vmatmul.mubr.f32.vlgmr.msra.gmra.mxu1 %v2913_v4 }
 0x5e9   : > { %3996 = vmatpush3.msra.mxu0 %v2948_v32  ;;  %4006 = vmatprep.subr.mxu1 %v4353_v33 }
 0x5ea   : > { %3997 = vmatprep.subr.mxu0 %v4353_v33  ;;  %4007 = vmatpush3.msra.mxu1 %v5117_v35 }
 0x5eb   : > { %3998 = vmatpush3.msra.mxu0 %v2955_v44  ;;  %4008 = vmatprep.subr.mxu1 %v4353_v33 }
 0x5ec   : > { %3999 = vmatprep.subr.mxu0 %v4353_v33  ;;  %4009 = vmatpush3.msra.mxu1 %v5120_v36 }
 0x5ed   : > { %4000 = vmatpush3.msra.mxu0 %v2962_v45  ;;  %4010 = vmatprep.subr.mxu1 %v4353_v33 }
 0x5ee   : > { %4001 = vmatprep.subr.mxu0 %v4353_v33  ;;  %4011 = vmatpush3.msra.mxu1 %v5122_v37 }
 0x5ef   : > { %4002 = vmatpush3.msra.mxu0 %v2969_v47  ;;  %4003 = vmatprep.mubr.msk.f32.mxu0 %vm4354_vm13, %v4353_v33 }
 0x5f0   : > { %4012 = vmatprep.subr.mxu1 %v4353_v33  ;;  %4004 = vmatmul.mubr.f32.vlgmr.msra.gmra.mxu0 %v2911_v53 }
 0x5f1   : > { %4013 = vmatpush3.msra.mxu1 %v5125_v39  ;;  %4014 = vmatprep.mubr.msk.f32.mxu1 %vm4354_vm13, %v4353_v33 }
 0x5f2   : > { %4015 = vmatmul.mubr.f32.vlgmr.msra.gmra.mxu1 %v2911_v53 }
 0x5f3   : > { %4254 = shalt.err (!%p4251_p1)
}
 0x5f4   : > { %p5298_p4 = pmov %p5297_p10  ;;  %v3511_v18 = vld [vmem:[%s503_s26] ss:$0 sm:$0xff]  ;;  %s3515_s15 = sshll.u32 %s4438_s21, 6 }
 0x5f5   : > { %s3360_s26 = sshll.u32 %s4569_s29, 4  ;;  %s5220_s23 = scalar_lea.hbm %s5274_s11, %s3515_s15  ;;  %s3361_s26 = int_to_ptr.vmem [resolvable:$true] %s3360_s26 }
 0x5f6   : > { %4034 = dma.vmem_to_hbm [thread:$0]  (%p5298_p4), %s3348_s13, 64, %s5273_s10, [#allocation5]  }
 0x5f7   : > { %s3336_s13 = scalar_lea.sflag [#allocation14], %s4555_s27  ;;  %s4265_s14 = scalar_lea.vmem %s3361_s26, 64 }
 0x5f8   : > { %p4266_p13 = scmp.ne.s32.totalorder %s3361_s26, %s4265_s14  ;;  %s4356_s22 = smov [#allocation13]  }
 0x5f9   : > { %s4269_s24 = sshll.u32 %s4356_s22, 4  ;;  %s4270_s24 = int_to_ptr.vmem [resolvable:$false] %s4269_s24 }
 0x5fa   : > { %p4267_p7 = pnand %p4266_p13, %p4462_p6  ;;  %s4271_s30 = scalar_lea.vmem %s4270_s24, 128 }
 0x5fb   : > { %p4272_p9 = scmp.lt.s32.totalorder %s3361_s26, %s4270_s24  ;;  %p4273_p10 = scmp.lt.s32.totalorder %s4271_s30, %s4265_s14 }
 0x5fc   : > { %p4268_p3 = pneg %p4267_p7 }
 0x5fd   : > { %p4274_p8 = por %p4273_p10, %p4272_p9 }
 0x5ff   : > { %p4275_p5 = pnand %p4274_p8, %p4268_p3 }
 0x69e   : > { %v3008_v23 = vpop.f32.mrf.mxu1 }
 0x69f   : > { %v2917_v14 = vpop.f32.mrf.mxu0 }
 0x6a0   : > { %v3972_v16 = vpop.f32.mrf.mxu1  ;;  %v2918_v19 = vadd.f32 %v3511_v18, %v2917_v14 }
 0x6a1   : > { %v3961_v15 = vpop.f32.mrf.mxu0 }
 0x6a2   : > { %v3009_v6 = vadd.f32 %v3008_v23, %v2918_v19 }
 0x6a7   : > { %v3088_v20 = vpop.f32.mrf.mxu0 }
 0x6a8   : > { %v3165_v56 = vpop.f32.mrf.mxu1  ;;  %v3089_v1 = vadd.f32 %v3088_v20, %v3009_v6 }
 0x6a9   : > { %v3983_v58 = vpop.f32.mrf.mxu0 }
 0x6aa   : > { %v3994_v60 = vpop.f32.mrf.mxu1  ;;  %v3166_v2 = vadd.f32 %v3165_v56, %v3089_v1 }
 0x6b0   : > { %v3248_v5 = vpop.f32.mrf.mxu0 }
 0x6b1   : > { %v3249_v7 = vadd.f32 %v3248_v5, %v3166_v2 }
 0x6b2   : > { %v3323_v8 = vpop.f32.mrf.mxu1  ;;  %v4005_v12 = vpop.f32.mrf.mxu0 }
 0x6b3   : > { %v3324_v61 = vadd.f32 %v3323_v8, %v3249_v7 }
 0x6b4   : > { %v4016_v0 = vpop.f32.mrf.mxu1 }
 0x6b5   : > { %v3512_v13 = vmul.f32 -1.442695, %v3324_v61 }
 0x6b7   : > { %4133 = vpow2.f32 %v3512_v13 }
 0x6c4   : > { %v4134_v62 = vpop.eup %4133 }
 0x6c5   : > { %v3330_v63 = vadd.f32 1.0, %v4134_v62 }
 0x6c7   : > { %4135 = vrcp.f32 %v3330_v63 }
 0x6d4   : > { %v4136_v17 = vpop.eup %4135 }
 0x6d5   : > { %v3333_v21 = vsel %vm5149_vm15, %v3324_v61, %v4136_v17 }
 0x6d6   : > { %3334 = vst [vmem:[%s4569_s29] sm:$0xf] %v3333_v21 }
 0x6d7   : > { %4278 = shalt.err (!%p4275_p5)
}
 0x6d8   : > { %s4279_s29 = scalar_lea.hbm %s5220_s23, 64  ;;  %s4283_s15 = scalar_lea.hbm %s5274_s11, 192 }
 0x6d9   : > { %p4280_p0 = scmp.ne.s32.totalorder %s5220_s23, %s4279_s29  ;;  %p4284_p1 = scmp.lt.s32.totalorder %s5220_s23, %s5274_s11 }
 0x6da   : > { %p4285_p4 = scmp.lt.s32.totalorder %s4283_s15, %s4279_s29 }
 0x6db   : > { %p4281_p2 = pnand %p4280_p0, %p4462_p6 }
 0x6dc   : > { %p4286_p13 = por %p4285_p4, %p4284_p1 }
 0x6dd   : > { %p4282_p12 = pneg %p4281_p2 }
 0x6df   : > { %p4287_p7 = pnand %p4286_p13, %p4282_p12 }
 0x6e1   : > { %4290 = shalt.err (!%p4287_p7)
}
 0x6e2   : > { %4035 = dma.vmem_to_hbm [thread:$0]  (%p4462_p6), %s3361_s26, 64, %s5220_s23, %s3336_s13  }
 0x6e3   : > { %p5299_p3 = scmp.eq.s32.totalorder %s4438_s21, 2 }
 0x6e5   : > { %4320 = dma.done.wait (%p5299_p3), [#allocation5], 64   ;;  %p5300_p9 = pmov %p5299_p3 }
 0x6e7   : > { %4322 = vsyncadd (%p5300_p9), [#allocation5], 4294967232 }
 0x6e8 PF: > { %p4066_p10 = scmp.ge.s32.totalorder %s4341_s20, 2  ;;  %s3376_s22 = sand.u32 1, %s4329_s17  }
 0x6e9   : > { %s3377_s24 = scalar_lea.sflag [#allocation14], %s3376_s22 }
 0x6ea   : > { %p4053_p8 = pnand %p4066_p10, %p4469_p11 }
 0x6ec   : > { %p4054_p5 = pneg %p4053_p8 }
 0x6ee   : > { %4324 = dma.done.wait (%p4054_p5), %s3377_s24, 64  }
 0x6ef   : > { %4326 = vsyncadd (%p4054_p5), %s3377_s24, 4294967232  ;;  %s5302_s20 = sld [smem:[#allocation20_spill]]  ;;  %s5304_s17 = smov %s4333_s18 }
 0x6f0   : > { %s5303_s28 = sld [smem:[#allocation21_spill]]  ;;  %s5305_s18 = smov %s4337_s19 }
 0x6f5   : > { %p26_p6 = scmp.ge.s32.totalorder %s5302_s20, 5  }
 0x6f6   : > { %s5306_s19 = smov %s5303_s28 }
 0x6f7   :  { %28 = sbr.rel (!%p26_p6) target bundleno = 7 (0x7), region = 173 }
 0x6fc   :  { %3382 = vsyncpa [#allocation4], 1 }
 0x6fd   :  { %3384 = vsyncpa [#allocation4 + $0x1], 1 }
 0x6fe   :  { %3385 = vsyncpa [#allocation7], 1 }
 0x6ff   :  { %3386 = vsyncpa [#allocation10], 1 }
 0x700   :  { %3387 = vsyncpa [#allocation5], 1 }
 0x701   :  { %3389 = vsyncpa [#allocation5 + $0x1], 1 }
 0x702   :  { %3390 = vsyncpa [#allocation14], 1 }
 0x703   :  { %3392 = vsyncpa [#allocation14 + $0x1], 1 }

</bundles_post_ra>
